<compile_context>
chip_gen: v6e
topology: v6e:2x2x1
jax: 0.10.0
libtpu: 0.0.40
codegen_flags: <defaults>
</compile_context>

<pallas_src>
import functools

import jax
import jax.numpy as jnp
from jax.experimental import pallas as pl
from jax.experimental.pallas import tpu as pltpu


def _spatial_attention_kernel(
    w_ref,      # SMEM (2*K*K,) f32 : conv weight, layout [in_ch][ky][kx]
    bn_ref,     # SMEM (2,)     f32 : [bn_scale, bn_bias]
    col_ref,    # VMEM (1, HW)  i32 : column index (i mod W) per flattened pixel
    x_ref,      # VMEM (C_TILE, HW) : lane-dense channel tile of one batch elem
    o_ref,      # VMEM (1, HW)      : lane-dense output row
    sum_ref,    # VMEM (1, HW)  f32 : running channel sum
    max_ref,    # VMEM (1, HW)  f32 : running channel max
    pflat_ref,  # VMEM (2, L)   f32 : row-padded flattened (avg, max) maps
    *, C, C_TILE, H, W, K, PAD, NEEDS_MASK):
    HW = H * W
    OFF = PAD + PAD * W          # left guard + PAD zero rows
    L = HW + 2 * OFF             # == pflat_ref.shape[1]

    ci = pl.program_id(1)

    # ---- channel-tile reduction (dominant pass, lane-dense) ----
    xf = x_ref[...].astype(jnp.float32)                       # (C_TILE, HW)
    if NEEDS_MASK:
        ch = ci * C_TILE + jax.lax.broadcasted_iota(jnp.int32, (C_TILE, 1), 0)
        valid = ch < C
        x_sum = jnp.where(valid, xf, 0.0)
        x_max = jnp.where(valid, xf, -jnp.inf)
    else:
        x_sum = xf
        x_max = xf
    part_sum = jnp.sum(x_sum, axis=0, keepdims=True)          # (1, HW)
    part_max = jnp.max(x_max, axis=0, keepdims=True)          # (1, HW)

    @pl.when(ci == 0)
    def _init():
        sum_ref[...] = part_sum
        max_ref[...] = part_max

    @pl.when(ci != 0)
    def _accumulate():
        sum_ref[...] = sum_ref[...] + part_sum
        max_ref[...] = jnp.maximum(max_ref[...], part_max)

    # ---- finalize: conv(2->1, KxK) + inference BatchNorm, once per batch ----
    @pl.when(ci == pl.num_programs(1) - 1)
    def _finalize():
        avg = sum_ref[...] * jnp.float32(1.0 / C)              # (1, HW)
        mx = max_ref[...]                                      # (1, HW)

        # Build the row-zero-padded, flattened 2-channel conv input.
        # Only the halo is zeroed; the interior is always fully overwritten.
        zeros_halo = jnp.zeros((2, OFF), jnp.float32)
        pflat_ref[:, :OFF] = zeros_halo
        pflat_ref[:, OFF + HW:] = zeros_halo
        pflat_ref[0:1, OFF:OFF + HW] = avg
        pflat_ref[1:2, OFF:OFF + HW] = mx

        # Load each padded band once; every tap is a static lane-shift of the
        # resident band (no per-tap misaligned VMEM loads).
        bands = [pflat_ref[c:c + 1, :] for c in range(2)]      # each (1, L)
        col = col_ref[...]                                     # (1, HW) i32

        acc = jnp.zeros((1, HW), jnp.float32)
        for dx in range(K):
            # Columns whose source x + dx - PAD falls outside [0, W) would read
            # the neighbouring row in the flattened layout -> mask to zero.
            tap_valid = (col >= PAD - dx) & (col < W + PAD - dx)
            acc_dx = jnp.zeros((1, HW), jnp.float32)
            for c in range(2):
                band = bands[c]
                for dy in range(K):
                    wv = w_ref[c * K * K + dy * K + dx]        # SMEM scalar
                    start = dy * W + dx                        # static offset
                    acc_dx = acc_dx + wv * band[:, start:start + HW]
            acc = acc + jnp.where(tap_valid, acc_dx, 0.0)

        # Inference-mode BatchNorm2d(1): scalar affine.
        o_ref[...] = (acc * bn_ref[0] + bn_ref[1]).astype(o_ref.dtype)


def spatial_attention_pallas(x, conv_w, bn_scale, bn_bias, *, kernel_size=7):
    """x: (B, C, H, W); conv_w: (1, 2, k, k); bn_scale/bn_bias: scalars.

    Returns (B, 1, H, W) with x.dtype, matching the PyTorch module's forward
    (with BatchNorm in inference mode).
    """
    assert kernel_size in (3, 7), "kernel size must be 3 or 7"
    pad = 3 if kernel_size == 7 else 1
    b, c, h, w = x.shape
    k = kernel_size
    assert conv_w.shape == (1, 2, k, k)
    hw = h * w

    # Lane-dense view of x for the channel reduction (free, contiguous).
    x_flat = x.reshape(b, c, hw)

    # Channel tile: bound one (double-buffered) input block to ~4 MiB so it fits
    # every generation's scoped-VMEM default; multiple of 8 when tiled.
    itemsize = jnp.dtype(x.dtype).itemsize
    budget = 4 * 1024 * 1024
    c_tile = min(c, max(1, budget // (hw * itemsize)))
    if c_tile < c:
        c_tile = max(8, (c_tile // 8) * 8)
        if c_tile > c:
            c_tile = c
    grid_c = pl.cdiv(c, c_tile)
    needs_mask = (c % c_tile) != 0

    off = pad + pad * w
    pflat_len = hw + 2 * off

    w_flat = conv_w.reshape(-1).astype(jnp.float32)                   # (2*k*k,)
    bn = jnp.stack([jnp.asarray(bn_scale, jnp.float32),
                    jnp.asarray(bn_bias, jnp.float32)])               # (2,)
    col_ids = (jnp.arange(hw, dtype=jnp.int32) % w).reshape(1, hw)    # (1, HW)

    kernel = functools.partial(
        _spatial_attention_kernel,
        C=c, C_TILE=c_tile, H=h, W=w, K=k, PAD=pad, NEEDS_MASK=needs_mask)

    # Generation-aware scoped-VMEM limit (~3/4 of physical VMEM):
    # v5e/v6e (128 MiB) -> 96 MiB; v7x per-TC (64 MiB) -> 48 MiB.
    try:
        vmem_cap = int(pltpu.get_tpu_info().vmem_capacity_bytes)
    except Exception:
        vmem_cap = 64 * 1024 * 1024
    vmem_limit = max(32 * 1024 * 1024,
                     min((vmem_cap * 3) // 4, 96 * 1024 * 1024))

    out_dtype = x.dtype
    cost = pl.CostEstimate(
        flops=int(2 * b * c * hw + 4 * b * hw * k * k),
        transcendentals=0,
        bytes_accessed=int(b * c * hw * itemsize
                           + b * hw * jnp.dtype(out_dtype).itemsize))

    out = pl.pallas_call(
        kernel,
        out_shape=jax.ShapeDtypeStruct((b, 1, hw), out_dtype),
        grid_spec=pltpu.PrefetchScalarGridSpec(
            num_scalar_prefetch=0,
            grid=(b, grid_c),                                  # C (reduction) last
            in_specs=[
                pl.BlockSpec(memory_space=pltpu.MemorySpace.SMEM),   # conv weight
                pl.BlockSpec(memory_space=pltpu.MemorySpace.SMEM),   # bn affine
                pl.BlockSpec((1, hw), lambda i, j: (0, 0)),          # column ids
                pl.BlockSpec((None, c_tile, hw), lambda i, j: (i, j, 0)),  # x tile
            ],
            out_specs=pl.BlockSpec((None, 1, hw), lambda i, j: (i, 0, 0)),
            scratch_shapes=[
                pltpu.VMEM((1, hw), jnp.float32),              # running sum
                pltpu.VMEM((1, hw), jnp.float32),              # running max
                pltpu.VMEM((2, pflat_len), jnp.float32),       # padded conv input
            ],
        ),
        compiler_params=pltpu.CompilerParams(
            dimension_semantics=("parallel", "arbitrary"),
            vmem_limit_bytes=int(vmem_limit),
        ),
        cost_estimate=cost,
    )(w_flat, bn, col_ids, x_flat)

    return out.reshape(b, 1, h, w)


def spatial_attention_ref(x, conv_w, bn_scale, bn_bias):
    """Pure-JAX reference mirroring the PyTorch forward (inference-mode BN)."""
    k = conv_w.shape[-1]
    pad = k // 2
    avg = jnp.mean(x, axis=1, keepdims=True)
    mx = jnp.max(x, axis=1, keepdims=True)
    inp = jnp.concatenate([avg, mx], axis=1)                           # (B,2,H,W)
    out = jax.lax.conv_general_dilated(
        inp, conv_w, window_strides=(1, 1),
        padding=[(pad, pad), (pad, pad)],
        dimension_numbers=("NCHW", "OIHW", "NCHW"))
    return out * bn_scale + bn_bias


if __name__ == "__main__":
    key = jax.random.PRNGKey(0)
    k_x, k_w = jax.random.split(key)

    B, C, H, W = 2, 4, 16, 16
    K = 7
    x = jax.random.normal(k_x, (B, C, H, W), dtype=jnp.float32)
    conv_w = 0.1 * jax.random.normal(k_w, (1, 2, K, K), dtype=jnp.float32)

    # BatchNorm2d(1) inference-mode parameters (PyTorch defaults).
    gamma, beta = jnp.float32(1.0), jnp.float32(0.0)
    run_mean, run_var, eps = jnp.float32(0.0), jnp.float32(1.0), 1e-5
    bn_scale = gamma / jnp.sqrt(run_var + eps)
    bn_bias = beta - run_mean * bn_scale

    out = spatial_attention_pallas(x, conv_w, bn_scale, bn_bias, kernel_size=K)
    out = jax.block_until_ready(out)

    ref = spatial_attention_ref(x, conv_w, bn_scale, bn_bias)
    assert out.shape == (B, 1, H, W) and out.dtype == x.dtype
    assert jnp.allclose(out, ref, atol=1e-4, rtol=1e-4), "mismatch vs reference"

    print("KERNEL_OK")
</pallas_src>

<mosaic_0001>
module attributes {stable_mosaic.version = 11 : i64} {
  func.func @_spatial_attention_kernel(%arg0: i32, %arg1: i32, %arg2: memref<98xf32, #tpu.memory_space<smem>>, %arg3: memref<2xf32, #tpu.memory_space<smem>>, %arg4: memref<1x256xi32, #tpu.memory_space<vmem>>, %arg5: memref<1x4x256xf32, #tpu.memory_space<vmem>>, %arg6: memref<1x1x256xf32, #tpu.memory_space<vmem>>, %arg7: memref<1x256xf32, #tpu.memory_space<vmem>>, %arg8: memref<1x256xf32, #tpu.memory_space<vmem>>, %arg9: memref<2x358xf32, #tpu.memory_space<vmem>>) attributes {dimension_semantics = [#tpu.dimension_semantics<parallel>, #tpu.dimension_semantics<arbitrary>], iteration_bounds = array<i64: 2, 1>, scalar_prefetch = 0 : i64, scratch_operands = 3 : i64, tpu.core_type = #tpu.core_type<tc>, window_params = [{transform_indices = @transform_0, window_bounds = array<i64: 98>}, {transform_indices = @transform_1, window_bounds = array<i64: 2>}, {pipeline_mode = #tpu.pipeline_mode<synchronous>, transform_indices = @transform_2, window_bounds = array<i64: 1, 256>}, {transform_indices = @transform_3, window_bounds = array<i64: 1, 4, 256>}, {transform_indices = @transform_4, window_bounds = array<i64: 1, 1, 256>}]} {
    %c0 = arith.constant 0 : index
    %c0_0 = arith.constant 0 : index
    %c0_1 = arith.constant 0 : index
    %0 = vector.load %arg5[%c0, %c0_0, %c0_1] : memref<1x4x256xf32, #tpu.memory_space<vmem>>, vector<1x4x256xf32>
    %1 = vector.shape_cast %0 : vector<1x4x256xf32> to vector<4x256xf32>
    %cst = arith.constant dense<0.000000e+00> : vector<256xf32>
    %2 = vector.multi_reduction <add>, %1, %cst [0] : vector<4x256xf32> to vector<256xf32>
    %3 = vector.shape_cast %2 : vector<256xf32> to vector<1x256xf32>
    %cst_2 = arith.constant dense<0xFF800000> : vector<256xf32>
    %4 = vector.multi_reduction <maximumf>, %1, %cst_2 [0] : vector<4x256xf32> to vector<256xf32>
    %5 = vector.shape_cast %4 : vector<256xf32> to vector<1x256xf32>
    %c0_i32 = arith.constant 0 : i32
    %6 = arith.cmpi eq, %arg1, %c0_i32 : i32
    %7 = arith.extui %6 : i1 to i32
    %c0_i32_3 = arith.constant 0 : i32
    %8 = arith.cmpi ne, %7, %c0_i32_3 : i32
    scf.if %8 {
      %c0_8 = arith.constant 0 : index
      %c0_9 = arith.constant 0 : index
      %15 = vector.load %arg7[%c0_8, %c0_9] : memref<1x256xf32, #tpu.memory_space<vmem>>, vector<1x256xf32>
      tpu.vector_store %arg7[%c0_8, %c0_9], %3 {strides = array<i32>} : memref<1x256xf32, #tpu.memory_space<vmem>>, vector<1x256xf32>,
      %c0_10 = arith.constant 0 : index
      %c0_11 = arith.constant 0 : index
      %16 = vector.load %arg8[%c0_10, %c0_11] : memref<1x256xf32, #tpu.memory_space<vmem>>, vector<1x256xf32>
      tpu.vector_store %arg8[%c0_10, %c0_11], %5 {strides = array<i32>} : memref<1x256xf32, #tpu.memory_space<vmem>>, vector<1x256xf32>,
    } else {
    }
    %c0_i32_4 = arith.constant 0 : i32
    %9 = arith.cmpi ne, %arg1, %c0_i32_4 : i32
    %10 = arith.extui %9 : i1 to i32
    %c0_i32_5 = arith.constant 0 : i32
    %11 = arith.cmpi ne, %10, %c0_i32_5 : i32
    scf.if %11 {
      %c0_8 = arith.constant 0 : index
      %c0_9 = arith.constant 0 : index
      %15 = vector.load %arg7[%c0_8, %c0_9] : memref<1x256xf32, #tpu.memory_space<vmem>>, vector<1x256xf32>
      %16 = arith.addf %15, %3 : vector<1x256xf32>
      %c0_10 = arith.constant 0 : index
      %c0_11 = arith.constant 0 : index
      %17 = vector.load %arg7[%c0_10, %c0_11] : memref<1x256xf32, #tpu.memory_space<vmem>>, vector<1x256xf32>
      tpu.vector_store %arg7[%c0_10, %c0_11], %16 {strides = array<i32>} : memref<1x256xf32, #tpu.memory_space<vmem>>, vector<1x256xf32>,
      %c0_12 = arith.constant 0 : index
      %c0_13 = arith.constant 0 : index
      %18 = vector.load %arg8[%c0_12, %c0_13] : memref<1x256xf32, #tpu.memory_space<vmem>>, vector<1x256xf32>
      %19 = arith.maximumf %18, %5 : vector<1x256xf32>
      %c0_14 = arith.constant 0 : index
      %c0_15 = arith.constant 0 : index
      %20 = vector.load %arg8[%c0_14, %c0_15] : memref<1x256xf32, #tpu.memory_space<vmem>>, vector<1x256xf32>
      tpu.vector_store %arg8[%c0_14, %c0_15], %19 {strides = array<i32>} : memref<1x256xf32, #tpu.memory_space<vmem>>, vector<1x256xf32>,
    } else {
    }
    %c0_i32_6 = arith.constant 0 : i32
    %12 = arith.cmpi eq, %arg1, %c0_i32_6 : i32
    %13 = arith.extui %12 : i1 to i32
    %c0_i32_7 = arith.constant 0 : i32
    %14 = arith.cmpi ne, %13, %c0_i32_7 : i32
    scf.if %14 {
      %c0_8 = arith.constant 0 : index
      %c0_9 = arith.constant 0 : index
      %15 = vector.load %arg7[%c0_8, %c0_9] : memref<1x256xf32, #tpu.memory_space<vmem>>, vector<1x256xf32>
      %cst_10 = arith.constant 2.500000e-01 : f32
      %16 = vector.broadcast %cst_10 : f32 to vector<1x256xf32>
      %17 = arith.mulf %15, %16 : vector<1x256xf32>
      %c0_11 = arith.constant 0 : index
      %c0_12 = arith.constant 0 : index
      %18 = vector.load %arg8[%c0_11, %c0_12] : memref<1x256xf32, #tpu.memory_space<vmem>>, vector<1x256xf32>
      %cst_13 = arith.constant 0.000000e+00 : f32
      %19 = vector.broadcast %cst_13 : f32 to vector<2x51xf32>
      %c0_14 = arith.constant 0 : index
      %c0_15 = arith.constant 0 : index
      %20 = vector.load %arg9[%c0_14, %c0_15] : memref<2x358xf32, #tpu.memory_space<vmem>>, vector<2x51xf32>
      tpu.vector_store %arg9[%c0_14, %c0_15], %19 {strides = array<i32>} : memref<2x358xf32, #tpu.memory_space<vmem>>, vector<2x51xf32>,
      %c0_16 = arith.constant 0 : index
      %c307 = arith.constant 307 : index
      %21 = vector.load %arg9[%c0_16, %c307] : memref<2x358xf32, #tpu.memory_space<vmem>>, vector<2x51xf32>
      tpu.vector_store %arg9[%c0_16, %c307], %19 {strides = array<i32>} : memref<2x358xf32, #tpu.memory_space<vmem>>, vector<2x51xf32>,
      %c0_17 = arith.constant 0 : index
      %c51 = arith.constant 51 : index
      %22 = vector.load %arg9[%c0_17, %c51] : memref<2x358xf32, #tpu.memory_space<vmem>>, vector<1x256xf32>
      tpu.vector_store %arg9[%c0_17, %c51], %17 {strides = array<i32>} : memref<2x358xf32, #tpu.memory_space<vmem>>, vector<1x256xf32>,
      %c1 = arith.constant 1 : index
      %c51_18 = arith.constant 51 : index
      %23 = vector.load %arg9[%c1, %c51_18] : memref<2x358xf32, #tpu.memory_space<vmem>>, vector<1x256xf32>
      tpu.vector_store %arg9[%c1, %c51_18], %18 {strides = array<i32>} : memref<2x358xf32, #tpu.memory_space<vmem>>, vector<1x256xf32>,
      %c0_19 = arith.constant 0 : index
      %c0_20 = arith.constant 0 : index
      %24 = vector.load %arg9[%c0_19, %c0_20] : memref<2x358xf32, #tpu.memory_space<vmem>>, vector<1x358xf32>
      %c1_21 = arith.constant 1 : index
      %c0_22 = arith.constant 0 : index
      %25 = vector.load %arg9[%c1_21, %c0_22] : memref<2x358xf32, #tpu.memory_space<vmem>>, vector<1x358xf32>
      %c0_23 = arith.constant 0 : index
      %c0_24 = arith.constant 0 : index
      %26 = vector.load %arg4[%c0_23, %c0_24] : memref<1x256xi32, #tpu.memory_space<vmem>>, vector<1x256xi32>
      %cst_25 = arith.constant 0.000000e+00 : f32
      %27 = vector.broadcast %cst_25 : f32 to vector<1x256xf32>
      %c3_i32 = arith.constant 3 : i32
      %28 = vector.broadcast %c3_i32 : i32 to vector<1x256xi32>
      %29 = arith.cmpi sge, %26, %28 : vector<1x256xi32>
      %c19_i32 = arith.constant 19 : i32
      %30 = vector.broadcast %c19_i32 : i32 to vector<1x256xi32>
      %31 = arith.cmpi slt, %26, %30 : vector<1x256xi32>
      %32 = arith.andi %29, %31 : vector<1x256xi1>
      %cst_26 = arith.constant 0.000000e+00 : f32
      %33 = vector.broadcast %cst_26 : f32 to vector<1x256xf32>
      %c0_27 = arith.constant 0 : index
      %34 = memref.load %arg2[%c0_27] : memref<98xf32, #tpu.memory_space<smem>>
      %35 = vector.extract_strided_slice %24 {offsets = [0, 0], sizes = [1, 256], strides = [1, 1]} : vector<1x358xf32> to vector<1x256xf32>
      %36 = vector.broadcast %34 : f32 to vector<1x256xf32>
      %37 = arith.mulf %36, %35 : vector<1x256xf32>
      %38 = arith.addf %33, %37 : vector<1x256xf32>
      %c7 = arith.constant 7 : index
      %39 = memref.load %arg2[%c7] : memref<98xf32, #tpu.memory_space<smem>>
      %40 = vector.extract_strided_slice %24 {offsets = [0, 16], sizes = [1, 256], strides = [1, 1]} : vector<1x358xf32> to vector<1x256xf32>
      %41 = vector.broadcast %39 : f32 to vector<1x256xf32>
      %42 = arith.mulf %41, %40 : vector<1x256xf32>
      %43 = arith.addf %38, %42 : vector<1x256xf32>
      %c14 = arith.constant 14 : index
      %44 = memref.load %arg2[%c14] : memref<98xf32, #tpu.memory_space<smem>>
      %45 = vector.extract_strided_slice %24 {offsets = [0, 32], sizes = [1, 256], strides = [1, 1]} : vector<1x358xf32> to vector<1x256xf32>
      %46 = vector.broadcast %44 : f32 to vector<1x256xf32>
      %47 = arith.mulf %46, %45 : vector<1x256xf32>
      %48 = arith.addf %43, %47 : vector<1x256xf32>
      %c21 = arith.constant 21 : index
      %49 = memref.load %arg2[%c21] : memref<98xf32, #tpu.memory_space<smem>>
      %50 = vector.extract_strided_slice %24 {offsets = [0, 48], sizes = [1, 256], strides = [1, 1]} : vector<1x358xf32> to vector<1x256xf32>
      %51 = vector.broadcast %49 : f32 to vector<1x256xf32>
      %52 = arith.mulf %51, %50 : vector<1x256xf32>
      %53 = arith.addf %48, %52 : vector<1x256xf32>
      %c28 = arith.constant 28 : index
      %54 = memref.load %arg2[%c28] : memref<98xf32, #tpu.memory_space<smem>>
      %55 = vector.extract_strided_slice %24 {offsets = [0, 64], sizes = [1, 256], strides = [1, 1]} : vector<1x358xf32> to vector<1x256xf32>
      %56 = vector.broadcast %54 : f32 to vector<1x256xf32>
      %57 = arith.mulf %56, %55 : vector<1x256xf32>
      %58 = arith.addf %53, %57 : vector<1x256xf32>
      %c35 = arith.constant 35 : index
      %59 = memref.load %arg2[%c35] : memref<98xf32, #tpu.memory_space<smem>>
      %60 = vector.extract_strided_slice %24 {offsets = [0, 80], sizes = [1, 256], strides = [1, 1]} : vector<1x358xf32> to vector<1x256xf32>
      %61 = vector.broadcast %59 : f32 to vector<1x256xf32>
      %62 = arith.mulf %61, %60 : vector<1x256xf32>
      %63 = arith.addf %58, %62 : vector<1x256xf32>
      %c42 = arith.constant 42 : index
      %64 = memref.load %arg2[%c42] : memref<98xf32, #tpu.memory_space<smem>>
      %65 = vector.extract_strided_slice %24 {offsets = [0, 96], sizes = [1, 256], strides = [1, 1]} : vector<1x358xf32> to vector<1x256xf32>
      %66 = vector.broadcast %64 : f32 to vector<1x256xf32>
      %67 = arith.mulf %66, %65 : vector<1x256xf32>
      %68 = arith.addf %63, %67 : vector<1x256xf32>
      %c49 = arith.constant 49 : index
      %69 = memref.load %arg2[%c49] : memref<98xf32, #tpu.memory_space<smem>>
      %70 = vector.extract_strided_slice %25 {offsets = [0, 0], sizes = [1, 256], strides = [1, 1]} : vector<1x358xf32> to vector<1x256xf32>
      %71 = vector.broadcast %69 : f32 to vector<1x256xf32>
      %72 = arith.mulf %71, %70 : vector<1x256xf32>
      %73 = arith.addf %68, %72 : vector<1x256xf32>
      %c56 = arith.constant 56 : index
      %74 = memref.load %arg2[%c56] : memref<98xf32, #tpu.memory_space<smem>>
      %75 = vector.extract_strided_slice %25 {offsets = [0, 16], sizes = [1, 256], strides = [1, 1]} : vector<1x358xf32> to vector<1x256xf32>
      %76 = vector.broadcast %74 : f32 to vector<1x256xf32>
      %77 = arith.mulf %76, %75 : vector<1x256xf32>
      %78 = arith.addf %73, %77 : vector<1x256xf32>
      %c63 = arith.constant 63 : index
      %79 = memref.load %arg2[%c63] : memref<98xf32, #tpu.memory_space<smem>>
      %80 = vector.extract_strided_slice %25 {offsets = [0, 32], sizes = [1, 256], strides = [1, 1]} : vector<1x358xf32> to vector<1x256xf32>
      %81 = vector.broadcast %79 : f32 to vector<1x256xf32>
      %82 = arith.mulf %81, %80 : vector<1x256xf32>
      %83 = arith.addf %78, %82 : vector<1x256xf32>
      %c70 = arith.constant 70 : index
      %84 = memref.load %arg2[%c70] : memref<98xf32, #tpu.memory_space<smem>>
      %85 = vector.extract_strided_slice %25 {offsets = [0, 48], sizes = [1, 256], strides = [1, 1]} : vector<1x358xf32> to vector<1x256xf32>
      %86 = vector.broadcast %84 : f32 to vector<1x256xf32>
      %87 = arith.mulf %86, %85 : vector<1x256xf32>
      %88 = arith.addf %83, %87 : vector<1x256xf32>
      %c77 = arith.constant 77 : index
      %89 = memref.load %arg2[%c77] : memref<98xf32, #tpu.memory_space<smem>>
      %90 = vector.extract_strided_slice %25 {offsets = [0, 64], sizes = [1, 256], strides = [1, 1]} : vector<1x358xf32> to vector<1x256xf32>
      %91 = vector.broadcast %89 : f32 to vector<1x256xf32>
      %92 = arith.mulf %91, %90 : vector<1x256xf32>
      %93 = arith.addf %88, %92 : vector<1x256xf32>
      %c84 = arith.constant 84 : index
      %94 = memref.load %arg2[%c84] : memref<98xf32, #tpu.memory_space<smem>>
      %95 = vector.extract_strided_slice %25 {offsets = [0, 80], sizes = [1, 256], strides = [1, 1]} : vector<1x358xf32> to vector<1x256xf32>
      %96 = vector.broadcast %94 : f32 to vector<1x256xf32>
      %97 = arith.mulf %96, %95 : vector<1x256xf32>
      %98 = arith.addf %93, %97 : vector<1x256xf32>
      %c91 = arith.constant 91 : index
      %99 = memref.load %arg2[%c91] : memref<98xf32, #tpu.memory_space<smem>>
      %100 = vector.extract_strided_slice %25 {offsets = [0, 96], sizes = [1, 256], strides = [1, 1]} : vector<1x358xf32> to vector<1x256xf32>
      %101 = vector.broadcast %99 : f32 to vector<1x256xf32>
      %102 = arith.mulf %101, %100 : vector<1x256xf32>
      %103 = arith.addf %98, %102 : vector<1x256xf32>
      %cst_28 = arith.constant 0.000000e+00 : f32
      %104 = vector.broadcast %cst_28 : f32 to vector<1x256xf32>
      %105 = arith.select %32, %103, %104 : vector<1x256xi1>, vector<1x256xf32>
      %106 = arith.addf %27, %105 : vector<1x256xf32>
      %c2_i32 = arith.constant 2 : i32
      %107 = vector.broadcast %c2_i32 : i32 to vector<1x256xi32>
      %108 = arith.cmpi sge, %26, %107 : vector<1x256xi32>
      %c18_i32 = arith.constant 18 : i32
      %109 = vector.broadcast %c18_i32 : i32 to vector<1x256xi32>
      %110 = arith.cmpi slt, %26, %109 : vector<1x256xi32>
      %111 = arith.andi %108, %110 : vector<1x256xi1>
      %cst_29 = arith.constant 0.000000e+00 : f32
      %112 = vector.broadcast %cst_29 : f32 to vector<1x256xf32>
      %c1_30 = arith.constant 1 : index
      %113 = memref.load %arg2[%c1_30] : memref<98xf32, #tpu.memory_space<smem>>
      %114 = vector.extract_strided_slice %24 {offsets = [0, 1], sizes = [1, 256], strides = [1, 1]} : vector<1x358xf32> to vector<1x256xf32>
      %115 = vector.broadcast %113 : f32 to vector<1x256xf32>
      %116 = arith.mulf %115, %114 : vector<1x256xf32>
      %117 = arith.addf %112, %116 : vector<1x256xf32>
      %c8 = arith.constant 8 : index
      %118 = memref.load %arg2[%c8] : memref<98xf32, #tpu.memory_space<smem>>
      %119 = vector.extract_strided_slice %24 {offsets = [0, 17], sizes = [1, 256], strides = [1, 1]} : vector<1x358xf32> to vector<1x256xf32>
      %120 = vector.broadcast %118 : f32 to vector<1x256xf32>
      %121 = arith.mulf %120, %119 : vector<1x256xf32>
      %122 = arith.addf %117, %121 : vector<1x256xf32>
      %c15 = arith.constant 15 : index
      %123 = memref.load %arg2[%c15] : memref<98xf32, #tpu.memory_space<smem>>
      %124 = vector.extract_strided_slice %24 {offsets = [0, 33], sizes = [1, 256], strides = [1, 1]} : vector<1x358xf32> to vector<1x256xf32>
      %125 = vector.broadcast %123 : f32 to vector<1x256xf32>
      %126 = arith.mulf %125, %124 : vector<1x256xf32>
      %127 = arith.addf %122, %126 : vector<1x256xf32>
      %c22 = arith.constant 22 : index
      %128 = memref.load %arg2[%c22] : memref<98xf32, #tpu.memory_space<smem>>
      %129 = vector.extract_strided_slice %24 {offsets = [0, 49], sizes = [1, 256], strides = [1, 1]} : vector<1x358xf32> to vector<1x256xf32>
      %130 = vector.broadcast %128 : f32 to vector<1x256xf32>
      %131 = arith.mulf %130, %129 : vector<1x256xf32>
      %132 = arith.addf %127, %131 : vector<1x256xf32>
      %c29 = arith.constant 29 : index
      %133 = memref.load %arg2[%c29] : memref<98xf32, #tpu.memory_space<smem>>
      %134 = vector.extract_strided_slice %24 {offsets = [0, 65], sizes = [1, 256], strides = [1, 1]} : vector<1x358xf32> to vector<1x256xf32>
      %135 = vector.broadcast %133 : f32 to vector<1x256xf32>
      %136 = arith.mulf %135, %134 : vector<1x256xf32>
      %137 = arith.addf %132, %136 : vector<1x256xf32>
      %c36 = arith.constant 36 : index
      %138 = memref.load %arg2[%c36] : memref<98xf32, #tpu.memory_space<smem>>
      %139 = vector.extract_strided_slice %24 {offsets = [0, 81], sizes = [1, 256], strides = [1, 1]} : vector<1x358xf32> to vector<1x256xf32>
      %140 = vector.broadcast %138 : f32 to vector<1x256xf32>
      %141 = arith.mulf %140, %139 : vector<1x256xf32>
      %142 = arith.addf %137, %141 : vector<1x256xf32>
      %c43 = arith.constant 43 : index
      %143 = memref.load %arg2[%c43] : memref<98xf32, #tpu.memory_space<smem>>
      %144 = vector.extract_strided_slice %24 {offsets = [0, 97], sizes = [1, 256], strides = [1, 1]} : vector<1x358xf32> to vector<1x256xf32>
      %145 = vector.broadcast %143 : f32 to vector<1x256xf32>
      %146 = arith.mulf %145, %144 : vector<1x256xf32>
      %147 = arith.addf %142, %146 : vector<1x256xf32>
      %c50 = arith.constant 50 : index
      %148 = memref.load %arg2[%c50] : memref<98xf32, #tpu.memory_space<smem>>
      %149 = vector.extract_strided_slice %25 {offsets = [0, 1], sizes = [1, 256], strides = [1, 1]} : vector<1x358xf32> to vector<1x256xf32>
      %150 = vector.broadcast %148 : f32 to vector<1x256xf32>
      %151 = arith.mulf %150, %149 : vector<1x256xf32>
      %152 = arith.addf %147, %151 : vector<1x256xf32>
      %c57 = arith.constant 57 : index
      %153 = memref.load %arg2[%c57] : memref<98xf32, #tpu.memory_space<smem>>
      %154 = vector.extract_strided_slice %25 {offsets = [0, 17], sizes = [1, 256], strides = [1, 1]} : vector<1x358xf32> to vector<1x256xf32>
      %155 = vector.broadcast %153 : f32 to vector<1x256xf32>
      %156 = arith.mulf %155, %154 : vector<1x256xf32>
      %157 = arith.addf %152, %156 : vector<1x256xf32>
      %c64 = arith.constant 64 : index
      %158 = memref.load %arg2[%c64] : memref<98xf32, #tpu.memory_space<smem>>
      %159 = vector.extract_strided_slice %25 {offsets = [0, 33], sizes = [1, 256], strides = [1, 1]} : vector<1x358xf32> to vector<1x256xf32>
      %160 = vector.broadcast %158 : f32 to vector<1x256xf32>
      %161 = arith.mulf %160, %159 : vector<1x256xf32>
      %162 = arith.addf %157, %161 : vector<1x256xf32>
      %c71 = arith.constant 71 : index
      %163 = memref.load %arg2[%c71] : memref<98xf32, #tpu.memory_space<smem>>
      %164 = vector.extract_strided_slice %25 {offsets = [0, 49], sizes = [1, 256], strides = [1, 1]} : vector<1x358xf32> to vector<1x256xf32>
      %165 = vector.broadcast %163 : f32 to vector<1x256xf32>
      %166 = arith.mulf %165, %164 : vector<1x256xf32>
      %167 = arith.addf %162, %166 : vector<1x256xf32>
      %c78 = arith.constant 78 : index
      %168 = memref.load %arg2[%c78] : memref<98xf32, #tpu.memory_space<smem>>
      %169 = vector.extract_strided_slice %25 {offsets = [0, 65], sizes = [1, 256], strides = [1, 1]} : vector<1x358xf32> to vector<1x256xf32>
      %170 = vector.broadcast %168 : f32 to vector<1x256xf32>
      %171 = arith.mulf %170, %169 : vector<1x256xf32>
      %172 = arith.addf %167, %171 : vector<1x256xf32>
      %c85 = arith.constant 85 : index
      %173 = memref.load %arg2[%c85] : memref<98xf32, #tpu.memory_space<smem>>
      %174 = vector.extract_strided_slice %25 {offsets = [0, 81], sizes = [1, 256], strides = [1, 1]} : vector<1x358xf32> to vector<1x256xf32>
      %175 = vector.broadcast %173 : f32 to vector<1x256xf32>
      %176 = arith.mulf %175, %174 : vector<1x256xf32>
      %177 = arith.addf %172, %176 : vector<1x256xf32>
      %c92 = arith.constant 92 : index
      %178 = memref.load %arg2[%c92] : memref<98xf32, #tpu.memory_space<smem>>
      %179 = vector.extract_strided_slice %25 {offsets = [0, 97], sizes = [1, 256], strides = [1, 1]} : vector<1x358xf32> to vector<1x256xf32>
      %180 = vector.broadcast %178 : f32 to vector<1x256xf32>
      %181 = arith.mulf %180, %179 : vector<1x256xf32>
      %182 = arith.addf %177, %181 : vector<1x256xf32>
      %cst_31 = arith.constant 0.000000e+00 : f32
      %183 = vector.broadcast %cst_31 : f32 to vector<1x256xf32>
      %184 = arith.select %111, %182, %183 : vector<1x256xi1>, vector<1x256xf32>
      %185 = arith.addf %106, %184 : vector<1x256xf32>
      %c1_i32 = arith.constant 1 : i32
      %186 = vector.broadcast %c1_i32 : i32 to vector<1x256xi32>
      %187 = arith.cmpi sge, %26, %186 : vector<1x256xi32>
      %c17_i32 = arith.constant 17 : i32
      %188 = vector.broadcast %c17_i32 : i32 to vector<1x256xi32>
      %189 = arith.cmpi slt, %26, %188 : vector<1x256xi32>
      %190 = arith.andi %187, %189 : vector<1x256xi1>
      %cst_32 = arith.constant 0.000000e+00 : f32
      %191 = vector.broadcast %cst_32 : f32 to vector<1x256xf32>
      %c2 = arith.constant 2 : index
      %192 = memref.load %arg2[%c2] : memref<98xf32, #tpu.memory_space<smem>>
      %193 = vector.extract_strided_slice %24 {offsets = [0, 2], sizes = [1, 256], strides = [1, 1]} : vector<1x358xf32> to vector<1x256xf32>
      %194 = vector.broadcast %192 : f32 to vector<1x256xf32>
      %195 = arith.mulf %194, %193 : vector<1x256xf32>
      %196 = arith.addf %191, %195 : vector<1x256xf32>
      %c9 = arith.constant 9 : index
      %197 = memref.load %arg2[%c9] : memref<98xf32, #tpu.memory_space<smem>>
      %198 = vector.extract_strided_slice %24 {offsets = [0, 18], sizes = [1, 256], strides = [1, 1]} : vector<1x358xf32> to vector<1x256xf32>
      %199 = vector.broadcast %197 : f32 to vector<1x256xf32>
      %200 = arith.mulf %199, %198 : vector<1x256xf32>
      %201 = arith.addf %196, %200 : vector<1x256xf32>
      %c16 = arith.constant 16 : index
      %202 = memref.load %arg2[%c16] : memref<98xf32, #tpu.memory_space<smem>>
      %203 = vector.extract_strided_slice %24 {offsets = [0, 34], sizes = [1, 256], strides = [1, 1]} : vector<1x358xf32> to vector<1x256xf32>
      %204 = vector.broadcast %202 : f32 to vector<1x256xf32>
      %205 = arith.mulf %204, %203 : vector<1x256xf32>
      %206 = arith.addf %201, %205 : vector<1x256xf32>
      %c23 = arith.constant 23 : index
      %207 = memref.load %arg2[%c23] : memref<98xf32, #tpu.memory_space<smem>>
      %208 = vector.extract_strided_slice %24 {offsets = [0, 50], sizes = [1, 256], strides = [1, 1]} : vector<1x358xf32> to vector<1x256xf32>
      %209 = vector.broadcast %207 : f32 to vector<1x256xf32>
      %210 = arith.mulf %209, %208 : vector<1x256xf32>
      %211 = arith.addf %206, %210 : vector<1x256xf32>
      %c30 = arith.constant 30 : index
      %212 = memref.load %arg2[%c30] : memref<98xf32, #tpu.memory_space<smem>>
      %213 = vector.extract_strided_slice %24 {offsets = [0, 66], sizes = [1, 256], strides = [1, 1]} : vector<1x358xf32> to vector<1x256xf32>
      %214 = vector.broadcast %212 : f32 to vector<1x256xf32>
      %215 = arith.mulf %214, %213 : vector<1x256xf32>
      %216 = arith.addf %211, %215 : vector<1x256xf32>
      %c37 = arith.constant 37 : index
      %217 = memref.load %arg2[%c37] : memref<98xf32, #tpu.memory_space<smem>>
      %218 = vector.extract_strided_slice %24 {offsets = [0, 82], sizes = [1, 256], strides = [1, 1]} : vector<1x358xf32> to vector<1x256xf32>
      %219 = vector.broadcast %217 : f32 to vector<1x256xf32>
      %220 = arith.mulf %219, %218 : vector<1x256xf32>
      %221 = arith.addf %216, %220 : vector<1x256xf32>
      %c44 = arith.constant 44 : index
      %222 = memref.load %arg2[%c44] : memref<98xf32, #tpu.memory_space<smem>>
      %223 = vector.extract_strided_slice %24 {offsets = [0, 98], sizes = [1, 256], strides = [1, 1]} : vector<1x358xf32> to vector<1x256xf32>
      %224 = vector.broadcast %222 : f32 to vector<1x256xf32>
      %225 = arith.mulf %224, %223 : vector<1x256xf32>
      %226 = arith.addf %221, %225 : vector<1x256xf32>
      %c51_33 = arith.constant 51 : index
      %227 = memref.load %arg2[%c51_33] : memref<98xf32, #tpu.memory_space<smem>>
      %228 = vector.extract_strided_slice %25 {offsets = [0, 2], sizes = [1, 256], strides = [1, 1]} : vector<1x358xf32> to vector<1x256xf32>
      %229 = vector.broadcast %227 : f32 to vector<1x256xf32>
      %230 = arith.mulf %229, %228 : vector<1x256xf32>
      %231 = arith.addf %226, %230 : vector<1x256xf32>
      %c58 = arith.constant 58 : index
      %232 = memref.load %arg2[%c58] : memref<98xf32, #tpu.memory_space<smem>>
      %233 = vector.extract_strided_slice %25 {offsets = [0, 18], sizes = [1, 256], strides = [1, 1]} : vector<1x358xf32> to vector<1x256xf32>
      %234 = vector.broadcast %232 : f32 to vector<1x256xf32>
      %235 = arith.mulf %234, %233 : vector<1x256xf32>
      %236 = arith.addf %231, %235 : vector<1x256xf32>
      %c65 = arith.constant 65 : index
      %237 = memref.load %arg2[%c65] : memref<98xf32, #tpu.memory_space<smem>>
      %238 = vector.extract_strided_slice %25 {offsets = [0, 34], sizes = [1, 256], strides = [1, 1]} : vector<1x358xf32> to vector<1x256xf32>
      %239 = vector.broadcast %237 : f32 to vector<1x256xf32>
      %240 = arith.mulf %239, %238 : vector<1x256xf32>
      %241 = arith.addf %236, %240 : vector<1x256xf32>
      %c72 = arith.constant 72 : index
      %242 = memref.load %arg2[%c72] : memref<98xf32, #tpu.memory_space<smem>>
      %243 = vector.extract_strided_slice %25 {offsets = [0, 50], sizes = [1, 256], strides = [1, 1]} : vector<1x358xf32> to vector<1x256xf32>
      %244 = vector.broadcast %242 : f32 to vector<1x256xf32>
      %245 = arith.mulf %244, %243 : vector<1x256xf32>
      %246 = arith.addf %241, %245 : vector<1x256xf32>
      %c79 = arith.constant 79 : index
      %247 = memref.load %arg2[%c79] : memref<98xf32, #tpu.memory_space<smem>>
      %248 = vector.extract_strided_slice %25 {offsets = [0, 66], sizes = [1, 256], strides = [1, 1]} : vector<1x358xf32> to vector<1x256xf32>
      %249 = vector.broadcast %247 : f32 to vector<1x256xf32>
      %250 = arith.mulf %249, %248 : vector<1x256xf32>
      %251 = arith.addf %246, %250 : vector<1x256xf32>
      %c86 = arith.constant 86 : index
      %252 = memref.load %arg2[%c86] : memref<98xf32, #tpu.memory_space<smem>>
      %253 = vector.extract_strided_slice %25 {offsets = [0, 82], sizes = [1, 256], strides = [1, 1]} : vector<1x358xf32> to vector<1x256xf32>
      %254 = vector.broadcast %252 : f32 to vector<1x256xf32>
      %255 = arith.mulf %254, %253 : vector<1x256xf32>
      %256 = arith.addf %251, %255 : vector<1x256xf32>
      %c93 = arith.constant 93 : index
      %257 = memref.load %arg2[%c93] : memref<98xf32, #tpu.memory_space<smem>>
      %258 = vector.extract_strided_slice %25 {offsets = [0, 98], sizes = [1, 256], strides = [1, 1]} : vector<1x358xf32> to vector<1x256xf32>
      %259 = vector.broadcast %257 : f32 to vector<1x256xf32>
      %260 = arith.mulf %259, %258 : vector<1x256xf32>
      %261 = arith.addf %256, %260 : vector<1x256xf32>
      %cst_34 = arith.constant 0.000000e+00 : f32
      %262 = vector.broadcast %cst_34 : f32 to vector<1x256xf32>
      %263 = arith.select %190, %261, %262 : vector<1x256xi1>, vector<1x256xf32>
      %264 = arith.addf %185, %263 : vector<1x256xf32>
      %c0_i32_35 = arith.constant 0 : i32
      %265 = vector.broadcast %c0_i32_35 : i32 to vector<1x256xi32>
      %266 = arith.cmpi sge, %26, %265 : vector<1x256xi32>
      %c16_i32 = arith.constant 16 : i32
      %267 = vector.broadcast %c16_i32 : i32 to vector<1x256xi32>
      %268 = arith.cmpi slt, %26, %267 : vector<1x256xi32>
      %269 = arith.andi %266, %268 : vector<1x256xi1>
      %cst_36 = arith.constant 0.000000e+00 : f32
      %270 = vector.broadcast %cst_36 : f32 to vector<1x256xf32>
      %c3 = arith.constant 3 : index
      %271 = memref.load %arg2[%c3] : memref<98xf32, #tpu.memory_space<smem>>
      %272 = vector.extract_strided_slice %24 {offsets = [0, 3], sizes = [1, 256], strides = [1, 1]} : vector<1x358xf32> to vector<1x256xf32>
      %273 = vector.broadcast %271 : f32 to vector<1x256xf32>
      %274 = arith.mulf %273, %272 : vector<1x256xf32>
      %275 = arith.addf %270, %274 : vector<1x256xf32>
      %c10 = arith.constant 10 : index
      %276 = memref.load %arg2[%c10] : memref<98xf32, #tpu.memory_space<smem>>
      %277 = vector.extract_strided_slice %24 {offsets = [0, 19], sizes = [1, 256], strides = [1, 1]} : vector<1x358xf32> to vector<1x256xf32>
      %278 = vector.broadcast %276 : f32 to vector<1x256xf32>
      %279 = arith.mulf %278, %277 : vector<1x256xf32>
      %280 = arith.addf %275, %279 : vector<1x256xf32>
      %c17 = arith.constant 17 : index
      %281 = memref.load %arg2[%c17] : memref<98xf32, #tpu.memory_space<smem>>
      %282 = vector.extract_strided_slice %24 {offsets = [0, 35], sizes = [1, 256], strides = [1, 1]} : vector<1x358xf32> to vector<1x256xf32>
      %283 = vector.broadcast %281 : f32 to vector<1x256xf32>
      %284 = arith.mulf %283, %282 : vector<1x256xf32>
      %285 = arith.addf %280, %284 : vector<1x256xf32>
      %c24 = arith.constant 24 : index
      %286 = memref.load %arg2[%c24] : memref<98xf32, #tpu.memory_space<smem>>
      %287 = vector.extract_strided_slice %24 {offsets = [0, 51], sizes = [1, 256], strides = [1, 1]} : vector<1x358xf32> to vector<1x256xf32>
      %288 = vector.broadcast %286 : f32 to vector<1x256xf32>
      %289 = arith.mulf %288, %287 : vector<1x256xf32>
      %290 = arith.addf %285, %289 : vector<1x256xf32>
      %c31 = arith.constant 31 : index
      %291 = memref.load %arg2[%c31] : memref<98xf32, #tpu.memory_space<smem>>
      %292 = vector.extract_strided_slice %24 {offsets = [0, 67], sizes = [1, 256], strides = [1, 1]} : vector<1x358xf32> to vector<1x256xf32>
      %293 = vector.broadcast %291 : f32 to vector<1x256xf32>
      %294 = arith.mulf %293, %292 : vector<1x256xf32>
      %295 = arith.addf %290, %294 : vector<1x256xf32>
      %c38 = arith.constant 38 : index
      %296 = memref.load %arg2[%c38] : memref<98xf32, #tpu.memory_space<smem>>
      %297 = vector.extract_strided_slice %24 {offsets = [0, 83], sizes = [1, 256], strides = [1, 1]} : vector<1x358xf32> to vector<1x256xf32>
      %298 = vector.broadcast %296 : f32 to vector<1x256xf32>
      %299 = arith.mulf %298, %297 : vector<1x256xf32>
      %300 = arith.addf %295, %299 : vector<1x256xf32>
      %c45 = arith.constant 45 : index
      %301 = memref.load %arg2[%c45] : memref<98xf32, #tpu.memory_space<smem>>
      %302 = vector.extract_strided_slice %24 {offsets = [0, 99], sizes = [1, 256], strides = [1, 1]} : vector<1x358xf32> to vector<1x256xf32>
      %303 = vector.broadcast %301 : f32 to vector<1x256xf32>
      %304 = arith.mulf %303, %302 : vector<1x256xf32>
      %305 = arith.addf %300, %304 : vector<1x256xf32>
      %c52 = arith.constant 52 : index
      %306 = memref.load %arg2[%c52] : memref<98xf32, #tpu.memory_space<smem>>
      %307 = vector.extract_strided_slice %25 {offsets = [0, 3], sizes = [1, 256], strides = [1, 1]} : vector<1x358xf32> to vector<1x256xf32>
      %308 = vector.broadcast %306 : f32 to vector<1x256xf32>
      %309 = arith.mulf %308, %307 : vector<1x256xf32>
      %310 = arith.addf %305, %309 : vector<1x256xf32>
      %c59 = arith.constant 59 : index
      %311 = memref.load %arg2[%c59] : memref<98xf32, #tpu.memory_space<smem>>
      %312 = vector.extract_strided_slice %25 {offsets = [0, 19], sizes = [1, 256], strides = [1, 1]} : vector<1x358xf32> to vector<1x256xf32>
      %313 = vector.broadcast %311 : f32 to vector<1x256xf32>
      %314 = arith.mulf %313, %312 : vector<1x256xf32>
      %315 = arith.addf %310, %314 : vector<1x256xf32>
      %c66 = arith.constant 66 : index
      %316 = memref.load %arg2[%c66] : memref<98xf32, #tpu.memory_space<smem>>
      %317 = vector.extract_strided_slice %25 {offsets = [0, 35], sizes = [1, 256], strides = [1, 1]} : vector<1x358xf32> to vector<1x256xf32>
      %318 = vector.broadcast %316 : f32 to vector<1x256xf32>
      %319 = arith.mulf %318, %317 : vector<1x256xf32>
      %320 = arith.addf %315, %319 : vector<1x256xf32>
      %c73 = arith.constant 73 : index
      %321 = memref.load %arg2[%c73] : memref<98xf32, #tpu.memory_space<smem>>
      %322 = vector.extract_strided_slice %25 {offsets = [0, 51], sizes = [1, 256], strides = [1, 1]} : vector<1x358xf32> to vector<1x256xf32>
      %323 = vector.broadcast %321 : f32 to vector<1x256xf32>
      %324 = arith.mulf %323, %322 : vector<1x256xf32>
      %325 = arith.addf %320, %324 : vector<1x256xf32>
      %c80 = arith.constant 80 : index
      %326 = memref.load %arg2[%c80] : memref<98xf32, #tpu.memory_space<smem>>
      %327 = vector.extract_strided_slice %25 {offsets = [0, 67], sizes = [1, 256], strides = [1, 1]} : vector<1x358xf32> to vector<1x256xf32>
      %328 = vector.broadcast %326 : f32 to vector<1x256xf32>
      %329 = arith.mulf %328, %327 : vector<1x256xf32>
      %330 = arith.addf %325, %329 : vector<1x256xf32>
      %c87 = arith.constant 87 : index
      %331 = memref.load %arg2[%c87] : memref<98xf32, #tpu.memory_space<smem>>
      %332 = vector.extract_strided_slice %25 {offsets = [0, 83], sizes = [1, 256], strides = [1, 1]} : vector<1x358xf32> to vector<1x256xf32>
      %333 = vector.broadcast %331 : f32 to vector<1x256xf32>
      %334 = arith.mulf %333, %332 : vector<1x256xf32>
      %335 = arith.addf %330, %334 : vector<1x256xf32>
      %c94 = arith.constant 94 : index
      %336 = memref.load %arg2[%c94] : memref<98xf32, #tpu.memory_space<smem>>
      %337 = vector.extract_strided_slice %25 {offsets = [0, 99], sizes = [1, 256], strides = [1, 1]} : vector<1x358xf32> to vector<1x256xf32>
      %338 = vector.broadcast %336 : f32 to vector<1x256xf32>
      %339 = arith.mulf %338, %337 : vector<1x256xf32>
      %340 = arith.addf %335, %339 : vector<1x256xf32>
      %cst_37 = arith.constant 0.000000e+00 : f32
      %341 = vector.broadcast %cst_37 : f32 to vector<1x256xf32>
      %342 = arith.select %269, %340, %341 : vector<1x256xi1>, vector<1x256xf32>
      %343 = arith.addf %264, %342 : vector<1x256xf32>
      %c-1_i32 = arith.constant -1 : i32
      %344 = vector.broadcast %c-1_i32 : i32 to vector<1x256xi32>
      %345 = arith.cmpi sge, %26, %344 : vector<1x256xi32>
      %c15_i32 = arith.constant 15 : i32
      %346 = vector.broadcast %c15_i32 : i32 to vector<1x256xi32>
      %347 = arith.cmpi slt, %26, %346 : vector<1x256xi32>
      %348 = arith.andi %345, %347 : vector<1x256xi1>
      %cst_38 = arith.constant 0.000000e+00 : f32
      %349 = vector.broadcast %cst_38 : f32 to vector<1x256xf32>
      %c4 = arith.constant 4 : index
      %350 = memref.load %arg2[%c4] : memref<98xf32, #tpu.memory_space<smem>>
      %351 = vector.extract_strided_slice %24 {offsets = [0, 4], sizes = [1, 256], strides = [1, 1]} : vector<1x358xf32> to vector<1x256xf32>
      %352 = vector.broadcast %350 : f32 to vector<1x256xf32>
      %353 = arith.mulf %352, %351 : vector<1x256xf32>
      %354 = arith.addf %349, %353 : vector<1x256xf32>
      %c11 = arith.constant 11 : index
      %355 = memref.load %arg2[%c11] : memref<98xf32, #tpu.memory_space<smem>>
      %356 = vector.extract_strided_slice %24 {offsets = [0, 20], sizes = [1, 256], strides = [1, 1]} : vector<1x358xf32> to vector<1x256xf32>
      %357 = vector.broadcast %355 : f32 to vector<1x256xf32>
      %358 = arith.mulf %357, %356 : vector<1x256xf32>
      %359 = arith.addf %354, %358 : vector<1x256xf32>
      %c18 = arith.constant 18 : index
      %360 = memref.load %arg2[%c18] : memref<98xf32, #tpu.memory_space<smem>>
      %361 = vector.extract_strided_slice %24 {offsets = [0, 36], sizes = [1, 256], strides = [1, 1]} : vector<1x358xf32> to vector<1x256xf32>
      %362 = vector.broadcast %360 : f32 to vector<1x256xf32>
      %363 = arith.mulf %362, %361 : vector<1x256xf32>
      %364 = arith.addf %359, %363 : vector<1x256xf32>
      %c25 = arith.constant 25 : index
      %365 = memref.load %arg2[%c25] : memref<98xf32, #tpu.memory_space<smem>>
      %366 = vector.extract_strided_slice %24 {offsets = [0, 52], sizes = [1, 256], strides = [1, 1]} : vector<1x358xf32> to vector<1x256xf32>
      %367 = vector.broadcast %365 : f32 to vector<1x256xf32>
      %368 = arith.mulf %367, %366 : vector<1x256xf32>
      %369 = arith.addf %364, %368 : vector<1x256xf32>
      %c32 = arith.constant 32 : index
      %370 = memref.load %arg2[%c32] : memref<98xf32, #tpu.memory_space<smem>>
      %371 = vector.extract_strided_slice %24 {offsets = [0, 68], sizes = [1, 256], strides = [1, 1]} : vector<1x358xf32> to vector<1x256xf32>
      %372 = vector.broadcast %370 : f32 to vector<1x256xf32>
      %373 = arith.mulf %372, %371 : vector<1x256xf32>
      %374 = arith.addf %369, %373 : vector<1x256xf32>
      %c39 = arith.constant 39 : index
      %375 = memref.load %arg2[%c39] : memref<98xf32, #tpu.memory_space<smem>>
      %376 = vector.extract_strided_slice %24 {offsets = [0, 84], sizes = [1, 256], strides = [1, 1]} : vector<1x358xf32> to vector<1x256xf32>
      %377 = vector.broadcast %375 : f32 to vector<1x256xf32>
      %378 = arith.mulf %377, %376 : vector<1x256xf32>
      %379 = arith.addf %374, %378 : vector<1x256xf32>
      %c46 = arith.constant 46 : index
      %380 = memref.load %arg2[%c46] : memref<98xf32, #tpu.memory_space<smem>>
      %381 = vector.extract_strided_slice %24 {offsets = [0, 100], sizes = [1, 256], strides = [1, 1]} : vector<1x358xf32> to vector<1x256xf32>
      %382 = vector.broadcast %380 : f32 to vector<1x256xf32>
      %383 = arith.mulf %382, %381 : vector<1x256xf32>
      %384 = arith.addf %379, %383 : vector<1x256xf32>
      %c53 = arith.constant 53 : index
      %385 = memref.load %arg2[%c53] : memref<98xf32, #tpu.memory_space<smem>>
      %386 = vector.extract_strided_slice %25 {offsets = [0, 4], sizes = [1, 256], strides = [1, 1]} : vector<1x358xf32> to vector<1x256xf32>
      %387 = vector.broadcast %385 : f32 to vector<1x256xf32>
      %388 = arith.mulf %387, %386 : vector<1x256xf32>
      %389 = arith.addf %384, %388 : vector<1x256xf32>
      %c60 = arith.constant 60 : index
      %390 = memref.load %arg2[%c60] : memref<98xf32, #tpu.memory_space<smem>>
      %391 = vector.extract_strided_slice %25 {offsets = [0, 20], sizes = [1, 256], strides = [1, 1]} : vector<1x358xf32> to vector<1x256xf32>
      %392 = vector.broadcast %390 : f32 to vector<1x256xf32>
      %393 = arith.mulf %392, %391 : vector<1x256xf32>
      %394 = arith.addf %389, %393 : vector<1x256xf32>
      %c67 = arith.constant 67 : index
      %395 = memref.load %arg2[%c67] : memref<98xf32, #tpu.memory_space<smem>>
      %396 = vector.extract_strided_slice %25 {offsets = [0, 36], sizes = [1, 256], strides = [1, 1]} : vector<1x358xf32> to vector<1x256xf32>
      %397 = vector.broadcast %395 : f32 to vector<1x256xf32>
      %398 = arith.mulf %397, %396 : vector<1x256xf32>
      %399 = arith.addf %394, %398 : vector<1x256xf32>
      %c74 = arith.constant 74 : index
      %400 = memref.load %arg2[%c74] : memref<98xf32, #tpu.memory_space<smem>>
      %401 = vector.extract_strided_slice %25 {offsets = [0, 52], sizes = [1, 256], strides = [1, 1]} : vector<1x358xf32> to vector<1x256xf32>
      %402 = vector.broadcast %400 : f32 to vector<1x256xf32>
      %403 = arith.mulf %402, %401 : vector<1x256xf32>
      %404 = arith.addf %399, %403 : vector<1x256xf32>
      %c81 = arith.constant 81 : index
      %405 = memref.load %arg2[%c81] : memref<98xf32, #tpu.memory_space<smem>>
      %406 = vector.extract_strided_slice %25 {offsets = [0, 68], sizes = [1, 256], strides = [1, 1]} : vector<1x358xf32> to vector<1x256xf32>
      %407 = vector.broadcast %405 : f32 to vector<1x256xf32>
      %408 = arith.mulf %407, %406 : vector<1x256xf32>
      %409 = arith.addf %404, %408 : vector<1x256xf32>
      %c88 = arith.constant 88 : index
      %410 = memref.load %arg2[%c88] : memref<98xf32, #tpu.memory_space<smem>>
      %411 = vector.extract_strided_slice %25 {offsets = [0, 84], sizes = [1, 256], strides = [1, 1]} : vector<1x358xf32> to vector<1x256xf32>
      %412 = vector.broadcast %410 : f32 to vector<1x256xf32>
      %413 = arith.mulf %412, %411 : vector<1x256xf32>
      %414 = arith.addf %409, %413 : vector<1x256xf32>
      %c95 = arith.constant 95 : index
      %415 = memref.load %arg2[%c95] : memref<98xf32, #tpu.memory_space<smem>>
      %416 = vector.extract_strided_slice %25 {offsets = [0, 100], sizes = [1, 256], strides = [1, 1]} : vector<1x358xf32> to vector<1x256xf32>
      %417 = vector.broadcast %415 : f32 to vector<1x256xf32>
      %418 = arith.mulf %417, %416 : vector<1x256xf32>
      %419 = arith.addf %414, %418 : vector<1x256xf32>
      %cst_39 = arith.constant 0.000000e+00 : f32
      %420 = vector.broadcast %cst_39 : f32 to vector<1x256xf32>
      %421 = arith.select %348, %419, %420 : vector<1x256xi1>, vector<1x256xf32>
      %422 = arith.addf %343, %421 : vector<1x256xf32>
      %c-2_i32 = arith.constant -2 : i32
      %423 = vector.broadcast %c-2_i32 : i32 to vector<1x256xi32>
      %424 = arith.cmpi sge, %26, %423 : vector<1x256xi32>
      %c14_i32 = arith.constant 14 : i32
      %425 = vector.broadcast %c14_i32 : i32 to vector<1x256xi32>
      %426 = arith.cmpi slt, %26, %425 : vector<1x256xi32>
      %427 = arith.andi %424, %426 : vector<1x256xi1>
      %cst_40 = arith.constant 0.000000e+00 : f32
      %428 = vector.broadcast %cst_40 : f32 to vector<1x256xf32>
      %c5 = arith.constant 5 : index
      %429 = memref.load %arg2[%c5] : memref<98xf32, #tpu.memory_space<smem>>
      %430 = vector.extract_strided_slice %24 {offsets = [0, 5], sizes = [1, 256], strides = [1, 1]} : vector<1x358xf32> to vector<1x256xf32>
      %431 = vector.broadcast %429 : f32 to vector<1x256xf32>
      %432 = arith.mulf %431, %430 : vector<1x256xf32>
      %433 = arith.addf %428, %432 : vector<1x256xf32>
      %c12 = arith.constant 12 : index
      %434 = memref.load %arg2[%c12] : memref<98xf32, #tpu.memory_space<smem>>
      %435 = vector.extract_strided_slice %24 {offsets = [0, 21], sizes = [1, 256], strides = [1, 1]} : vector<1x358xf32> to vector<1x256xf32>
      %436 = vector.broadcast %434 : f32 to vector<1x256xf32>
      %437 = arith.mulf %436, %435 : vector<1x256xf32>
      %438 = arith.addf %433, %437 : vector<1x256xf32>
      %c19 = arith.constant 19 : index
      %439 = memref.load %arg2[%c19] : memref<98xf32, #tpu.memory_space<smem>>
      %440 = vector.extract_strided_slice %24 {offsets = [0, 37], sizes = [1, 256], strides = [1, 1]} : vector<1x358xf32> to vector<1x256xf32>
      %441 = vector.broadcast %439 : f32 to vector<1x256xf32>
      %442 = arith.mulf %441, %440 : vector<1x256xf32>
      %443 = arith.addf %438, %442 : vector<1x256xf32>
      %c26 = arith.constant 26 : index
      %444 = memref.load %arg2[%c26] : memref<98xf32, #tpu.memory_space<smem>>
      %445 = vector.extract_strided_slice %24 {offsets = [0, 53], sizes = [1, 256], strides = [1, 1]} : vector<1x358xf32> to vector<1x256xf32>
      %446 = vector.broadcast %444 : f32 to vector<1x256xf32>
      %447 = arith.mulf %446, %445 : vector<1x256xf32>
      %448 = arith.addf %443, %447 : vector<1x256xf32>
      %c33 = arith.constant 33 : index
      %449 = memref.load %arg2[%c33] : memref<98xf32, #tpu.memory_space<smem>>
      %450 = vector.extract_strided_slice %24 {offsets = [0, 69], sizes = [1, 256], strides = [1, 1]} : vector<1x358xf32> to vector<1x256xf32>
      %451 = vector.broadcast %449 : f32 to vector<1x256xf32>
      %452 = arith.mulf %451, %450 : vector<1x256xf32>
      %453 = arith.addf %448, %452 : vector<1x256xf32>
      %c40 = arith.constant 40 : index
      %454 = memref.load %arg2[%c40] : memref<98xf32, #tpu.memory_space<smem>>
      %455 = vector.extract_strided_slice %24 {offsets = [0, 85], sizes = [1, 256], strides = [1, 1]} : vector<1x358xf32> to vector<1x256xf32>
      %456 = vector.broadcast %454 : f32 to vector<1x256xf32>
      %457 = arith.mulf %456, %455 : vector<1x256xf32>
      %458 = arith.addf %453, %457 : vector<1x256xf32>
      %c47 = arith.constant 47 : index
      %459 = memref.load %arg2[%c47] : memref<98xf32, #tpu.memory_space<smem>>
      %460 = vector.extract_strided_slice %24 {offsets = [0, 101], sizes = [1, 256], strides = [1, 1]} : vector<1x358xf32> to vector<1x256xf32>
      %461 = vector.broadcast %459 : f32 to vector<1x256xf32>
      %462 = arith.mulf %461, %460 : vector<1x256xf32>
      %463 = arith.addf %458, %462 : vector<1x256xf32>
      %c54 = arith.constant 54 : index
      %464 = memref.load %arg2[%c54] : memref<98xf32, #tpu.memory_space<smem>>
      %465 = vector.extract_strided_slice %25 {offsets = [0, 5], sizes = [1, 256], strides = [1, 1]} : vector<1x358xf32> to vector<1x256xf32>
      %466 = vector.broadcast %464 : f32 to vector<1x256xf32>
      %467 = arith.mulf %466, %465 : vector<1x256xf32>
      %468 = arith.addf %463, %467 : vector<1x256xf32>
      %c61 = arith.constant 61 : index
      %469 = memref.load %arg2[%c61] : memref<98xf32, #tpu.memory_space<smem>>
      %470 = vector.extract_strided_slice %25 {offsets = [0, 21], sizes = [1, 256], strides = [1, 1]} : vector<1x358xf32> to vector<1x256xf32>
      %471 = vector.broadcast %469 : f32 to vector<1x256xf32>
      %472 = arith.mulf %471, %470 : vector<1x256xf32>
      %473 = arith.addf %468, %472 : vector<1x256xf32>
      %c68 = arith.constant 68 : index
      %474 = memref.load %arg2[%c68] : memref<98xf32, #tpu.memory_space<smem>>
      %475 = vector.extract_strided_slice %25 {offsets = [0, 37], sizes = [1, 256], strides = [1, 1]} : vector<1x358xf32> to vector<1x256xf32>
      %476 = vector.broadcast %474 : f32 to vector<1x256xf32>
      %477 = arith.mulf %476, %475 : vector<1x256xf32>
      %478 = arith.addf %473, %477 : vector<1x256xf32>
      %c75 = arith.constant 75 : index
      %479 = memref.load %arg2[%c75] : memref<98xf32, #tpu.memory_space<smem>>
      %480 = vector.extract_strided_slice %25 {offsets = [0, 53], sizes = [1, 256], strides = [1, 1]} : vector<1x358xf32> to vector<1x256xf32>
      %481 = vector.broadcast %479 : f32 to vector<1x256xf32>
      %482 = arith.mulf %481, %480 : vector<1x256xf32>
      %483 = arith.addf %478, %482 : vector<1x256xf32>
      %c82 = arith.constant 82 : index
      %484 = memref.load %arg2[%c82] : memref<98xf32, #tpu.memory_space<smem>>
      %485 = vector.extract_strided_slice %25 {offsets = [0, 69], sizes = [1, 256], strides = [1, 1]} : vector<1x358xf32> to vector<1x256xf32>
      %486 = vector.broadcast %484 : f32 to vector<1x256xf32>
      %487 = arith.mulf %486, %485 : vector<1x256xf32>
      %488 = arith.addf %483, %487 : vector<1x256xf32>
      %c89 = arith.constant 89 : index
      %489 = memref.load %arg2[%c89] : memref<98xf32, #tpu.memory_space<smem>>
      %490 = vector.extract_strided_slice %25 {offsets = [0, 85], sizes = [1, 256], strides = [1, 1]} : vector<1x358xf32> to vector<1x256xf32>
      %491 = vector.broadcast %489 : f32 to vector<1x256xf32>
      %492 = arith.mulf %491, %490 : vector<1x256xf32>
      %493 = arith.addf %488, %492 : vector<1x256xf32>
      %c96 = arith.constant 96 : index
      %494 = memref.load %arg2[%c96] : memref<98xf32, #tpu.memory_space<smem>>
      %495 = vector.extract_strided_slice %25 {offsets = [0, 101], sizes = [1, 256], strides = [1, 1]} : vector<1x358xf32> to vector<1x256xf32>
      %496 = vector.broadcast %494 : f32 to vector<1x256xf32>
      %497 = arith.mulf %496, %495 : vector<1x256xf32>
      %498 = arith.addf %493, %497 : vector<1x256xf32>
      %cst_41 = arith.constant 0.000000e+00 : f32
      %499 = vector.broadcast %cst_41 : f32 to vector<1x256xf32>
      %500 = arith.select %427, %498, %499 : vector<1x256xi1>, vector<1x256xf32>
      %501 = arith.addf %422, %500 : vector<1x256xf32>
      %c-3_i32 = arith.constant -3 : i32
      %502 = vector.broadcast %c-3_i32 : i32 to vector<1x256xi32>
      %503 = arith.cmpi sge, %26, %502 : vector<1x256xi32>
      %c13_i32 = arith.constant 13 : i32
      %504 = vector.broadcast %c13_i32 : i32 to vector<1x256xi32>
      %505 = arith.cmpi slt, %26, %504 : vector<1x256xi32>
      %506 = arith.andi %503, %505 : vector<1x256xi1>
      %cst_42 = arith.constant 0.000000e+00 : f32
      %507 = vector.broadcast %cst_42 : f32 to vector<1x256xf32>
      %c6 = arith.constant 6 : index
      %508 = memref.load %arg2[%c6] : memref<98xf32, #tpu.memory_space<smem>>
      %509 = vector.extract_strided_slice %24 {offsets = [0, 6], sizes = [1, 256], strides = [1, 1]} : vector<1x358xf32> to vector<1x256xf32>
      %510 = vector.broadcast %508 : f32 to vector<1x256xf32>
      %511 = arith.mulf %510, %509 : vector<1x256xf32>
      %512 = arith.addf %507, %511 : vector<1x256xf32>
      %c13 = arith.constant 13 : index
      %513 = memref.load %arg2[%c13] : memref<98xf32, #tpu.memory_space<smem>>
      %514 = vector.extract_strided_slice %24 {offsets = [0, 22], sizes = [1, 256], strides = [1, 1]} : vector<1x358xf32> to vector<1x256xf32>
      %515 = vector.broadcast %513 : f32 to vector<1x256xf32>
      %516 = arith.mulf %515, %514 : vector<1x256xf32>
      %517 = arith.addf %512, %516 : vector<1x256xf32>
      %c20 = arith.constant 20 : index
      %518 = memref.load %arg2[%c20] : memref<98xf32, #tpu.memory_space<smem>>
      %519 = vector.extract_strided_slice %24 {offsets = [0, 38], sizes = [1, 256], strides = [1, 1]} : vector<1x358xf32> to vector<1x256xf32>
      %520 = vector.broadcast %518 : f32 to vector<1x256xf32>
      %521 = arith.mulf %520, %519 : vector<1x256xf32>
      %522 = arith.addf %517, %521 : vector<1x256xf32>
      %c27 = arith.constant 27 : index
      %523 = memref.load %arg2[%c27] : memref<98xf32, #tpu.memory_space<smem>>
      %524 = vector.extract_strided_slice %24 {offsets = [0, 54], sizes = [1, 256], strides = [1, 1]} : vector<1x358xf32> to vector<1x256xf32>
      %525 = vector.broadcast %523 : f32 to vector<1x256xf32>
      %526 = arith.mulf %525, %524 : vector<1x256xf32>
      %527 = arith.addf %522, %526 : vector<1x256xf32>
      %c34 = arith.constant 34 : index
      %528 = memref.load %arg2[%c34] : memref<98xf32, #tpu.memory_space<smem>>
      %529 = vector.extract_strided_slice %24 {offsets = [0, 70], sizes = [1, 256], strides = [1, 1]} : vector<1x358xf32> to vector<1x256xf32>
      %530 = vector.broadcast %528 : f32 to vector<1x256xf32>
      %531 = arith.mulf %530, %529 : vector<1x256xf32>
      %532 = arith.addf %527, %531 : vector<1x256xf32>
      %c41 = arith.constant 41 : index
      %533 = memref.load %arg2[%c41] : memref<98xf32, #tpu.memory_space<smem>>
      %534 = vector.extract_strided_slice %24 {offsets = [0, 86], sizes = [1, 256], strides = [1, 1]} : vector<1x358xf32> to vector<1x256xf32>
      %535 = vector.broadcast %533 : f32 to vector<1x256xf32>
      %536 = arith.mulf %535, %534 : vector<1x256xf32>
      %537 = arith.addf %532, %536 : vector<1x256xf32>
      %c48 = arith.constant 48 : index
      %538 = memref.load %arg2[%c48] : memref<98xf32, #tpu.memory_space<smem>>
      %539 = vector.extract_strided_slice %24 {offsets = [0, 102], sizes = [1, 256], strides = [1, 1]} : vector<1x358xf32> to vector<1x256xf32>
      %540 = vector.broadcast %538 : f32 to vector<1x256xf32>
      %541 = arith.mulf %540, %539 : vector<1x256xf32>
      %542 = arith.addf %537, %541 : vector<1x256xf32>
      %c55 = arith.constant 55 : index
      %543 = memref.load %arg2[%c55] : memref<98xf32, #tpu.memory_space<smem>>
      %544 = vector.extract_strided_slice %25 {offsets = [0, 6], sizes = [1, 256], strides = [1, 1]} : vector<1x358xf32> to vector<1x256xf32>
      %545 = vector.broadcast %543 : f32 to vector<1x256xf32>
      %546 = arith.mulf %545, %544 : vector<1x256xf32>
      %547 = arith.addf %542, %546 : vector<1x256xf32>
      %c62 = arith.constant 62 : index
      %548 = memref.load %arg2[%c62] : memref<98xf32, #tpu.memory_space<smem>>
      %549 = vector.extract_strided_slice %25 {offsets = [0, 22], sizes = [1, 256], strides = [1, 1]} : vector<1x358xf32> to vector<1x256xf32>
      %550 = vector.broadcast %548 : f32 to vector<1x256xf32>
      %551 = arith.mulf %550, %549 : vector<1x256xf32>
      %552 = arith.addf %547, %551 : vector<1x256xf32>
      %c69 = arith.constant 69 : index
      %553 = memref.load %arg2[%c69] : memref<98xf32, #tpu.memory_space<smem>>
      %554 = vector.extract_strided_slice %25 {offsets = [0, 38], sizes = [1, 256], strides = [1, 1]} : vector<1x358xf32> to vector<1x256xf32>
      %555 = vector.broadcast %553 : f32 to vector<1x256xf32>
      %556 = arith.mulf %555, %554 : vector<1x256xf32>
      %557 = arith.addf %552, %556 : vector<1x256xf32>
      %c76 = arith.constant 76 : index
      %558 = memref.load %arg2[%c76] : memref<98xf32, #tpu.memory_space<smem>>
      %559 = vector.extract_strided_slice %25 {offsets = [0, 54], sizes = [1, 256], strides = [1, 1]} : vector<1x358xf32> to vector<1x256xf32>
      %560 = vector.broadcast %558 : f32 to vector<1x256xf32>
      %561 = arith.mulf %560, %559 : vector<1x256xf32>
      %562 = arith.addf %557, %561 : vector<1x256xf32>
      %c83 = arith.constant 83 : index
      %563 = memref.load %arg2[%c83] : memref<98xf32, #tpu.memory_space<smem>>
      %564 = vector.extract_strided_slice %25 {offsets = [0, 70], sizes = [1, 256], strides = [1, 1]} : vector<1x358xf32> to vector<1x256xf32>
      %565 = vector.broadcast %563 : f32 to vector<1x256xf32>
      %566 = arith.mulf %565, %564 : vector<1x256xf32>
      %567 = arith.addf %562, %566 : vector<1x256xf32>
      %c90 = arith.constant 90 : index
      %568 = memref.load %arg2[%c90] : memref<98xf32, #tpu.memory_space<smem>>
      %569 = vector.extract_strided_slice %25 {offsets = [0, 86], sizes = [1, 256], strides = [1, 1]} : vector<1x358xf32> to vector<1x256xf32>
      %570 = vector.broadcast %568 : f32 to vector<1x256xf32>
      %571 = arith.mulf %570, %569 : vector<1x256xf32>
      %572 = arith.addf %567, %571 : vector<1x256xf32>
      %c97 = arith.constant 97 : index
      %573 = memref.load %arg2[%c97] : memref<98xf32, #tpu.memory_space<smem>>
      %574 = vector.extract_strided_slice %25 {offsets = [0, 102], sizes = [1, 256], strides = [1, 1]} : vector<1x358xf32> to vector<1x256xf32>
      %575 = vector.broadcast %573 : f32 to vector<1x256xf32>
      %576 = arith.mulf %575, %574 : vector<1x256xf32>
      %577 = arith.addf %572, %576 : vector<1x256xf32>
      %cst_43 = arith.constant 0.000000e+00 : f32
      %578 = vector.broadcast %cst_43 : f32 to vector<1x256xf32>
      %579 = arith.select %506, %577, %578 : vector<1x256xi1>, vector<1x256xf32>
      %580 = arith.addf %501, %579 : vector<1x256xf32>
      %c0_44 = arith.constant 0 : index
      %581 = memref.load %arg3[%c0_44] : memref<2xf32, #tpu.memory_space<smem>>
      %582 = vector.broadcast %581 : f32 to vector<1x256xf32>
      %583 = arith.mulf %580, %582 : vector<1x256xf32>
      %c1_45 = arith.constant 1 : index
      %584 = memref.load %arg3[%c1_45] : memref<2xf32, #tpu.memory_space<smem>>
      %585 = vector.broadcast %584 : f32 to vector<1x256xf32>
      %586 = arith.addf %583, %585 : vector<1x256xf32>
      %c0_46 = arith.constant 0 : index
      %c0_47 = arith.constant 0 : index
      %c0_48 = arith.constant 0 : index
      %587 = vector.load %arg6[%c0_46, %c0_47, %c0_48] : memref<1x1x256xf32, #tpu.memory_space<vmem>>, vector<1x1x256xf32>
      %588 = vector.shape_cast %587 : vector<1x1x256xf32> to vector<1x256xf32>
      %589 = vector.shape_cast %586 : vector<1x256xf32> to vector<1x1x256xf32>
      tpu.vector_store %arg6[%c0_46, %c0_47, %c0_48], %589 {strides = array<i32>} : memref<1x1x256xf32, #tpu.memory_space<vmem>>, vector<1x1x256xf32>,
    } else {
    }
    return
  }
  func.func @transform_0(%arg0: i32, %arg1: i32) -> i32 {
    %c0_i32 = arith.constant 0 : i32
    %c0_i32_0 = arith.constant 0 : i32
    return %c0_i32 : i32
  }
  func.func @transform_1(%arg0: i32, %arg1: i32) -> i32 {
    %c0_i32 = arith.constant 0 : i32
    %c0_i32_0 = arith.constant 0 : i32
    return %c0_i32 : i32
  }
  func.func @transform_2(%arg0: i32, %arg1: i32) -> (i32, i32) {
    %c0_i32 = arith.constant 0 : i32
    %c0_i32_0 = arith.constant 0 : i32
    %c0_i32_1 = arith.constant 0 : i32
    return %c0_i32, %c0_i32_0 : i32, i32
  }
  func.func @transform_3(%arg0: i32, %arg1: i32) -> (i32, i32, i32) {
    %c0_i32 = arith.constant 0 : i32
    %c0_i32_0 = arith.constant 0 : i32
    return %arg0, %arg1, %c0_i32 : i32, i32, i32
  }
  func.func @transform_4(%arg0: i32, %arg1: i32) -> (i32, i32, i32) {
    %c0_i32 = arith.constant 0 : i32
    %c0_i32_0 = arith.constant 0 : i32
    %c0_i32_1 = arith.constant 0 : i32
    return %arg0, %c0_i32, %c0_i32_0 : i32, i32, i32
  }
}

</mosaic_0001>

<bundles_post_ra>
// kernel: tpu_custom_call.1
= control target key start
LH: loop header
LB: loop body
LE: loop exit
PB: predicated region body
PF: predicated region fallthrough
CT: control target
= control target key end

     0   :  { %9 = vsyncpa [#allocation8], 0  ;;  %s2660_s0 = inlined_call_operand.hbm [shape: f32[98], index: 0, kind: input, shape index: {}]   ;;  %s2661_s1 = inlined_call_operand.vmem [shape: f32[2], index: 1, kind: input, shape index: {}]   ;;  %s2662_s2 = inlined_call_operand.vmem [shape: s32[1,256], index: 2, kind: input, shape index: {}]   ;;  %s2663_s3 = inlined_call_operand.hbm [shape: f32[2,4,256], index: 3, kind: input, shape index: {}]   ;;  %s2664_s4 = inlined_call_operand.hbm [shape: f32[2,1,256], index: 4, kind: output, shape index: {}]  }
   0x1   :  { %10 = vsyncpa [#allocation9], 0 }
   0x2   :  { %11 = vsyncpa [#allocation6], 0 }
   0x3   :  { %13 = vsyncpa [#allocation6 + $0x1], 0 }
   0x4   :  { %14 = vsyncpa [#allocation7], 0 }
   0x5   :  { %16 = vsyncpa [#allocation7 + $0x1], 0  ;;  %s1933_s15 = smov 0   ;;  %s1935_s16 = smov 0  }
   0x6   :  { %s1937_s17 = smov 0   ;;  %s1939_s18 = smov 0  }
   0x7   :  { %s1941_s19 = smov 0   ;;  %s1943_s20 = smov 0  }
   0x8 LB: > { %s1526_s21 = sadd.s32 4294967295, %s1887_s20   ;;  %s1527_s22 = sadd.s32 4294967294, %s1887_s20   ;;  %s1887_s20 = sphi %s1943_s20, %s22_s20   ;;  %s1883_s19 = sphi %s1941_s19, %s2706_s19   ;;  %s1879_s18 = sphi %s1939_s18, %s2705_s18   ;;  %s1875_s17 = sphi %s1937_s17, %s2704_s17   ;;  %s1871_s16 = sphi %s1935_s16, %s2703_s16   ;;  %s1867_s15 = sphi %s1933_s15, %s2702_s15  }
   0x9   : > { %p119_p0 = scmp.ne.s32.totalorder %s1871_s16, %s1867_s15  ;;  %p1967_p1 = scmp.eq.s32.totalorder %s1526_s21, 0 }
   0xa   : > { %p1971_p2 = scmp.eq.s32.totalorder %s1526_s21, 1  ;;  %p149_p3 = scmp.eq.s32.totalorder %s1527_s22, 1 }
   0xb   : > { %p1977_p4 = por %p1967_p1, %p119_p0  ;;  %p1528_p5 = scmp.ge.s32.totalorder %s1887_s20, 1 }
   0xc   : > { %p1982_p6 = por %p149_p3, %p119_p0  ;;  %p156_p7 = scmp.lt.s32.totalorder %s1887_s20, 3 }
   0xd   : > { %s178_s30 = sshll.u32 %s2661_s1, 4  ;;  %s34_s6 = sadd.s32 1, %s1883_s19  ;;  %s179_s30 = int_to_ptr.vmem [resolvable:$true] %s178_s30 }
   0xe   : > { %s2670_s26 = scalar_select %p1982_p6, 1, 0 }
   0xf   : > { %p1987_p8 = pnand %p1528_p5, %p156_p7  ;;  %p2004_p12 = scmp.ge.s32.totalorder %s34_s6, 2 }
  0x10   : > { %s1889_s8 = smov [#allocation5]   ;;  %s1756_s11 = scalar_lea.vmem %s179_s30, 16 }
  0x11   : > { %p1657_p10 = pneg %p1987_p8  ;;  %p1757_p13 = scmp.ne.s32.totalorder %s179_s30, %s1756_s11 }
  0x12   : > { %p1764_p7 = scmp.lt.s32.totalorder %s179_s30, %s179_s30 }
  0x13   : > { %p1999_p11 = pnand %p1657_p10, %p1967_p1  ;;  %p1765_p10 = scmp.lt.s32.totalorder %s1756_s11, %s1756_s11 }
  0x15   : > { %1660 = dma.hbm_to_smem (!%p1999_p11), %s2660_s0, 16, %s1889_s8, [#allocation8]  }
  0x16   : > { %p1758_p0 = pneg %p1999_p11  ;;  %p1766_p9 = por %p1765_p10, %p1764_p7 }
  0x18   : > { %p1759_p3 = pnand %p1758_p0, %p1757_p13 }
  0x1a   : > { %p1760_p5 = pneg %p1759_p3 }
  0x1c   : > { %p1767_p6 = pnand %p1766_p9, %p1760_p5 }
  0x1e   : > { %1770 = shalt.err (!%p1767_p6)
}
  0x1f   : > { %s1890_s12 = smov [#allocation10]   ;;  %s2708_s6 = smov (%p2004_p12, %s34_s6), 0 }
  0x20   : > { %1663 = dma.vmem_to_smem (!%p1999_p11), %s179_s30, 16, %s1890_s12, [#allocation9]  }
  0x21   : > { %s106_s13 = sadd.s32 1, %s1875_s17  ;;  %p113_p6 = scmp.ne.s32.totalorder %s1875_s17, %s1871_s16 }
  0x22   : > { %s101_s14 = ssub.s32 %s1883_s19, %s2708_s6  ;;  %p114_p9 = scmp.eq.s32.totalorder %s1887_s20, 0 }
  0x23   : > { %p104_p13 = scmp.eq.s32.totalorder %s101_s14, 0  ;;  %p2029_p0 = por %p1971_p2, %p113_p6 }
  0x24   : > { %p115_p3 = por %p114_p9, %p113_p6  ;;  %p1674_p5 = scmp.lt.s32.totalorder %s1887_s20, 2 }
  0x25   : > { %s2035_s22 = scalar_select %p104_p13, %s1875_s17, %s106_s13  }
  0x26   : > { %s192_s28 = sand.u32 1, %s1875_s17   ;;  %s1643_s29 = sshll.u32 %s1883_s19, 7 }
  0x27   : > { %s1532_s30 = sshll.u32 %s192_s28, 3  ;;  %s204_s8 = scalar_lea.hbm %s2663_s3, %s1643_s29 }
  0x28   : > { %s196_s9 = scalar_lea.vmem [#allocation11], %s1532_s30  ;;  %p2042_p11 = pnand %p1674_p5, %p115_p3 }
  0x29   : > { %s206_s10 = sshll.u32 %s196_s9, 4  ;;  %s193_s24 = scalar_lea.sflag [#allocation6], %s192_s28  ;;  %s207_s10 = int_to_ptr.vmem [resolvable:$true] %s206_s10 }
  0x2a   : > { %p1773_p2 = pneg %p2042_p11  ;;  %s1784_s12 = scalar_lea.vmem %s207_s10, 128 }
  0x2b   : > { %p1785_p12 = scmp.ne.s32.totalorder %s207_s10, %s1784_s12  ;;  %s1891_s13 = smov [#allocation11]  }
  0x2c   : > { %s1789_s14 = sshll.u32 %s1891_s13, 4  ;;  %s1790_s14 = int_to_ptr.vmem [resolvable:$false] %s1789_s14 }
  0x2d   : > { %p1787_p7 = pnand %p1785_p12, %p1773_p2  ;;  %s1791_s5 = scalar_lea.vmem %s1790_s14, 256 }
  0x2e   : > { %p1792_p6 = scmp.lt.s32.totalorder %s207_s10, %s1790_s14  ;;  %p1793_p9 = scmp.lt.s32.totalorder %s1791_s5, %s1784_s12 }
  0x2f   : > { %p1788_p10 = pneg %p1787_p7 }
  0x30   : > { %p1794_p13 = por %p1793_p9, %p1792_p6 }
  0x32   : > { %p1795_p3 = pnand %p1794_p13, %p1788_p10 }
  0x34   : > { %1798 = shalt.err (!%p1795_p3)
}
  0x35   : > { %1667 = dma.hbm_to_vmem [thread:$0]  (!%p2042_p11), %s204_s8, 128, %s207_s10, %s193_s24  }
  0x36   : > { %215 = sbr.rel (%p1987_p8) target bundleno = 642 (0x282), region = 36 }
  0x3b   : > { %1850 = dma.done.wait (%p1967_p1), [#allocation8], 16  }
  0x3c   : > { %1852 = vsyncadd (%p1967_p1), [#allocation8], 4294967280 }
  0x3d   : > { %1854 = dma.done.wait (%p1967_p1), [#allocation9], 16  }
  0x3e   : > { %1856 = vsyncadd (%p1967_p1), [#allocation9], 4294967280  ;;  %s2061_s28 = sand.u32 1, %s1871_s16  }
  0x3f   : > { %s1538_s27 = sshll.u32 %s2061_s28, 3  ;;  %s226_s29 = scalar_lea.sflag [#allocation6], %s2061_s28 }
  0x40   : > { %s229_s30 = scalar_lea.vmem [#allocation11], %s1538_s27 }
  0x41   : > { %1858 = dma.done.wait (%p1977_p4), %s226_s29, 128  }
  0x42   : > { %1860 = vsyncadd (%p1977_p4), %s226_s29, 4294967168 }
  0x43   : > { %234 = sfence }
  0x44   : > { %v255_v0 = vld [vmem:[%s229_s30] sm:$0xff]  ;;  %vm259_vm0 = vcmask 1043456   ;;  %vm390_vm1 = vcmask 410624   ;;  %v1892_v12 = vmov 0.0   ;;  %v1893_v13 = vmov 1966171168  }
  0x45   : > { %v257_v1 = vcombine.high %v255_v0, %v255_v0  ;;  %v274_v2 = vsel %vm259_vm0, %v255_v0, -inf  ;;  %v260_v3 = vsel %vm259_vm0, %v255_v0, 0.0  ;;  %391 = vst.msk [vmem:[#allocation4] sm:$0x3] %vm390_vm1, %v1892_v12  ;;  %v296_v14 = vunpack.c.l.s4 %v1893_v13  ;;  %s1894_s23 = smov 51   ;;  %s1561_s25 = sld [smem:[#allocation5 + $0x39]] }
  0x46   : > { %v275_v4 = vrot.slane %v274_v2, 4  ;;  %v261_v5 = vrot.slane %v260_v3, 4  ;;  %v298_v15 = vlaneseq  ;;  %vm392_vm2 = vcmask 828824   ;;  %s1547_s7 = sld [smem:[#allocation5 + $0x38]]  ;;  %s1895_s13 = smov 112  }
  0x47   : > { %v281_v6 = vsel %vm259_vm0, %v257_v1, -inf  ;;  %v267_v7 = vsel %vm259_vm0, %v257_v1, 0.0  ;;  %393 = vst.msk [vmem:[#allocation4 + $0x4] sm:$0x3] %vm392_vm2, %v1892_v12  ;;  %v297_v24 = vunpack.c.0.s8 %v296_v14  ;;  %v2676_v41 = vmov 0  ;;  %s1575_s8 = sld [smem:[#allocation5 + $0x3a]] }
  0x48   : > { %v276_v8 = vmax.f32 %v274_v2, %v275_v4  ;;  %v282_v9 = vrot.slane %v281_v6, 4  ;;  %v262_v10 = vadd.f32 %v261_v5, %v260_v3  ;;  %v268_v11 = vrot.slane %v267_v7, 4  ;;  %s1562_s9 = sld [smem:[#allocation5 + $0x40]]  ;;  %s1896_s27 = smov 96  }
  0x49   : > { %v299_v25 = vshrl.u32 %v298_v15, 7  ;;  %vm2069_vm3 = vcmp.lt.s32.totalorder %v298_v15, 256  ;;  %vm2077_vm4 = vcmp.ge.s32.totalorder %v298_v15, 51  ;;  %vm2081_vm5 = vcmp.lt.s32.totalorder %v298_v15, 307  ;;  %s1563_s10 = sld [smem:[#allocation5 + $0x47]] }
  0x4a   : > { %v277_v16 = vrot.slane %v276_v8, 2  ;;  %v283_v17 = vmax.f32 %v281_v6, %v282_v9  ;;  %v263_v18 = vrot.slane %v262_v10, 2  ;;  %v269_v19 = vadd.f32 %v268_v11, %v267_v7  ;;  %vm404_vm7 = vmand %vm2077_vm4, %vm2081_vm5  ;;  %s1576_s11 = sld [smem:[#allocation5 + $0x41]] }
  0x4b   : > { %v300_v35 = vsub.s32 %v297_v24, %v299_v25  ;;  %v2677_v41 = vsel %vm2069_vm3, 4294967295, %v2676_v41  ;;  %vm398_vm6 = vcmask 416768   ;;  %v628_v55 = vstv %s1561_s25  ;;  %s1589_s24 = sld [smem:[#allocation5 + $0x3b]] }
  0x4c   : > { %v278_v20 = vmax.f32 %v276_v8, %v277_v16  ;;  %v284_v21 = vrot.slane %v283_v17, 2  ;;  %v264_v22 = vadd.f32 %v263_v18, %v262_v10  ;;  %v270_v23 = vrot.slane %v269_v19, 2  ;;  %2678 = vst [vmem:[#allocation17_spill] sm:$0xff] %v2677_v41  ;;  %s1564_s12 = sld [smem:[#allocation5 + $0x4e]] }
  0x4d   : > { %v495_v56 = vstv %s1547_s7  ;;  %v768_v60 = vstv %s1575_s8  ;;  %s1577_s14 = sld [smem:[#allocation5 + $0x48]]  ;;  %s1898_s8 = smov 64   ;;  %vm431_vm8 = vcmask 916480   ;;  %vm442_vm9 = vcmask 785408  }
  0x4e   : > { %v279_v26 = vrot.slane %v278_v20, 1  ;;  %v285_v27 = vmax.f32 %v283_v17, %v284_v21  ;;  %v265_v28 = vrot.slane %v264_v22, 1  ;;  %v271_v29 = vadd.f32 %v270_v23, %v269_v19  ;;  %s1590_s5 = sld [smem:[#allocation5 + $0x42]] }
  0x4f   : > { %v638_v61 = vstv %s1562_s9  ;;  %v648_v0 = vstv %s1563_s10  ;;  %s1603_s29 = sld [smem:[#allocation5 + $0x3c]]  ;;  %vm453_vm10 = vcmask 654336   ;;  %vm464_vm11 = vcmask 523264  }
  0x50   : > { %v280_v30 = vmax.f32 %v278_v20, %v279_v26  ;;  %v286_v31 = vrot.slane %v285_v27, 1  ;;  %v266_v32 = vadd.f32 %v265_v28, %v264_v22  ;;  %v272_v33 = vrot.slane %v271_v29, 1  ;;  %s1578_s30 = sld [smem:[#allocation5 + $0x4f]] }
  0x51   : > { %v778_v1 = vstv %s1576_s11  ;;  %v908_v4 = vstv %s1589_s24  ;;  %s1565_s25 = sld [smem:[#allocation5 + $0x55]]  ;;  %vm475_vm12 = vcmask 392192   ;;  %vm486_vm13 = vcmask 261120  }
  0x52   : > { %v287_v34 = vmax.f32 %v285_v27, %v286_v31  ;;  %v273_v36 = vadd.f32 %v272_v33, %v271_v29  ;;  %v658_v5 = vstv %s1564_s12  ;;  %s1604_s7 = sld [smem:[#allocation5 + $0x43]]  ;;  %vm691_vm0 = vcmask 1039360  }
  0x53   : > { %v788_v8 = vstv %s1577_s14  ;;  %s1591_s9 = sld [smem:[#allocation5 + $0x49]] }
  0x54   : > { %v317_v37 = vcombine.low %v280_v30, %v287_v34  ;;  %v294_v38 = vcombine.low %v266_v32, %v273_v36  ;;  %v918_v9 = vstv %s1590_s5  ;;  %s1566_s10 = sld [smem:[#allocation5 + $0x5c]]  ;;  %s1899_s5 = smov 48  }
  0x55   : > { %v1048_v12 = vstv %s1603_s29  ;;  %s1617_s11 = sld [smem:[#allocation5 + $0x3d]] }
  0x56   : > { %v324_v39 = vrot.slane %v317_v37, %v300_v35  ;;  %v301_v40 = vrot.slane %v294_v38, %v300_v35  ;;  %v798_v13 = vstv %s1578_s30  ;;  %s1592_s24 = sld [smem:[#allocation5 + $0x50]] }
  0x57   : > { %v668_v16 = vstv %s1565_s25  ;;  %s1579_s12 = sld [smem:[#allocation5 + $0x56]]  ;;  %s1900_s25 = smov 32  }
  0x58   : > { %v331_v42 = vrot.slane %v324_v39, %v300_v35  ;;  %v308_v43 = vrot.slane %v301_v40, %v300_v35  ;;  %v1058_v17 = vstv %s1604_s7  ;;  %s1618_s14 = sld [smem:[#allocation5 + $0x44]] }
  0x59   : > { %v928_v20 = vstv %s1591_s9  ;;  %s1605_s29 = sld [smem:[#allocation5 + $0x4a]] }
  0x5a   : > { %333 = vst.msk [vmem:[#allocation3] sm:$0x3] %vm2069_vm3, %v331_v42  ;;  %314 = vst.msk [vmem:[#allocation2] sm:$0x3] %vm2069_vm3, %v308_v43  ;;  %v678_v21 = vstv %s1566_s10  ;;  %s1580_s30 = sld [smem:[#allocation5 + $0x5d]] }
  0x5b   : > { %v1188_v24 = vstv %s1617_s11  ;;  %s1631_s7 = sld [smem:[#allocation5 + $0x3e]] }
  0x5c   : > { %v938_v25 = vstv %s1592_s24  ;;  %s1606_s9 = sld [smem:[#allocation5 + $0x51]] }
  0x5d   : > { %v808_v28 = vstv %s1579_s12  ;;  %s1593_s10 = sld [smem:[#allocation5 + $0x57]] }
  0x5e   : > { %v1198_v29 = vstv %s1618_s14  ;;  %s1632_s11 = sld [smem:[#allocation5 + $0x45]] }
  0x5f   : > { %v1068_v32 = vstv %s1605_s29  ;;  %s1619_s24 = sld [smem:[#allocation5 + $0x4b]] }
  0x60   : > { %v818_v33 = vstv %s1580_s30  ;;  %s1607_s12 = sld [smem:[#allocation5 + $0x58]] }
  0x61   : > { %v389_v44 = vld [vmem:[#allocation3] sm:$0x3]  ;;  %v387_v45 = vld [vmem:[#allocation2] sm:$0x3]  ;;  %v1328_v36 = vstv %s1631_s7  ;;  %s1542_s14 = sld [smem:[#allocation5 + $0x15]] }
  0x62   : > { %407 = vrot.lane.b32.xlu0 %v389_v44, %s1894_s23  ;;  %v388_v46 = vmul.f32 0.25, %v387_v45  ;;  %v1078_v37 = vstv %s1606_s9  ;;  %s1594_s29 = sld [smem:[#allocation5 + $0x5e]] }
  0x63   : > { %v948_v40 = vstv %s1593_s10  ;;  %s1544_s30 = sld [smem:[#allocation5 + $0x23]] }
  0x64   : > { %v1338_v42 = vstv %s1632_s11  ;;  %s1540_s7 = sld [smem:[#allocation5 + $0x7]] }
  0x65   : > { %v1208_v45 = vstv %s1619_s24  ;;  %s1555_s9 = sld [smem:[#allocation5 + $0xf]] }
  0x66   : > { %395 = vrot.lane.b32.xlu0 %v388_v46, %s1894_s23  ;;  %s1897_s23 = smov 80   ;;  %v1088_v46 = vstv %s1607_s12  ;;  %s1541_s10 = sld [smem:[#allocation5 + $0xe]] }
  0x67   : > { %v447_v48 = vstv %s1542_s14  ;;  %s1556_s11 = sld [smem:[#allocation5 + $0x16]] }
  0x68   : > { %s1543_s24 = sld [smem:[#allocation5 + $0x1c]] }
  0x69   : > { %s1582_s12 = sld [smem:[#allocation5 + $0xa]] }
  0x6a   : > { %s1545_s14 = sld [smem:[#allocation5 + $0x2a]] }
  0xd4   : > { %v408_v49 = vpop.permute.xlu0 %407 }
  0xd5   : > { %v409_v50 = vrot.slane %v408_v49, 7 }
  0xd7   : > { %v410_v51 = vsel %vm398_vm6, %v409_v50, %v408_v49 }
  0xd8   : > { %413 = vst.msk [vmem:[#allocation4 + $0x1] ss:$2 sm:$0x7] %vm404_vm7, %v410_v51  ;;  %v396_v52 = vpop.permute.xlu0 %395  ;;  %v958_v51 = vstv %s1594_s29  ;;  %s1570_s29 = sld [smem:[#allocation5 + $0x17]] }
  0xd9   : > { %v397_v53 = vrot.slane %v396_v52, 7 }
  0xdb   : > { %v399_v54 = vsel %vm398_vm6, %v397_v53, %v396_v52  ;;  %vm831_vm6 = vcmask 1031168  }
  0xdc   : > { %405 = vst.msk [vmem:[#allocation4] ss:$2 sm:$0x7] %vm404_vm7, %v399_v54  ;;  %v469_v54 = vstv %s1544_s30  ;;  %s1554_s30 = sld [smem:[#allocation5 + $0x8]] }
  0xdf   : > { %v2089_v57 = vld [vmem:[#allocation4 + $0x1] ss:$2 sm:$0x7] }
  0xe0   : > { %v629_v58 = vmul.f32 %v628_v55, %v2089_v57  ;;  %v496_v59 = vmul.f32 %v495_v56, %v2089_v57  ;;  %v769_v62 = vmul.f32 %v768_v60, %v2089_v57  ;;  %v639_v63 = vmul.f32 %v638_v61, %v2089_v57 }
  0xe1   : > { %v649_v2 = vmul.f32 %v648_v0, %v2089_v57  ;;  %v779_v3 = vmul.f32 %v778_v1, %v2089_v57  ;;  %v909_v6 = vmul.f32 %v908_v4, %v2089_v57  ;;  %v659_v7 = vmul.f32 %v658_v5, %v2089_v57 }
  0xe2   : > { %631 = vrot.lane.b32.xlu1 %v629_v58, %s1895_s13  ;;  %498 = vrot.lane.b32.xlu0 %v496_v59, %s1895_s13  ;;  %v789_v10 = vmul.f32 %v788_v8, %v2089_v57  ;;  %v919_v11 = vmul.f32 %v918_v9, %v2089_v57  ;;  %v1049_v14 = vmul.f32 %v1048_v12, %v2089_v57  ;;  %v425_v55 = vstv %s1540_s7  ;;  %s1596_s7 = sld [smem:[#allocation5 + $0xb]] }
  0xe3   : > { %v799_v15 = vmul.f32 %v798_v13, %v2089_v57  ;;  %v669_v18 = vmul.f32 %v668_v16, %v2089_v57  ;;  %v1059_v19 = vmul.f32 %v1058_v17, %v2089_v57  ;;  %v929_v22 = vmul.f32 %v928_v20, %v2089_v57  ;;  %v2143_v47 = vld [vmem:[#allocation4] ss:$2 sm:$0x7] }
  0xe4   : > { %v679_v23 = vmul.f32 %v678_v21, %v2089_v57  ;;  %v1189_v26 = vmul.f32 %v1188_v24, %v2089_v57  ;;  %v939_v27 = vmul.f32 %v938_v25, %v2089_v57  ;;  %v809_v30 = vmul.f32 %v808_v28, %v2089_v57 }
  0xe5   : > { %v1199_v31 = vmul.f32 %v1198_v29, %v2089_v57  ;;  %v1069_v34 = vmul.f32 %v1068_v32, %v2089_v57  ;;  %v819_v35 = vmul.f32 %v818_v33, %v2089_v57  ;;  %v1329_v38 = vmul.f32 %v1328_v36, %v2089_v57 }
  0xe6   : > { %771 = vrot.lane.b32.xlu1 %v769_v62, %s1895_s13  ;;  %641 = vrot.lane.b32.xlu0 %v639_v63, %s1896_s27  ;;  %v1079_v39 = vmul.f32 %v1078_v37, %v2089_v57  ;;  %v949_v43 = vmul.f32 %v948_v40, %v2089_v57  ;;  %v1339_v44 = vmul.f32 %v1338_v42, %v2089_v57  ;;  %v574_v59 = vstv %s1555_s9  ;;  %s1568_s9 = sld [smem:[#allocation5 + $0x9]] }
  0xe7   : > { %v1209_v49 = vmul.f32 %v1208_v45, %v2089_v57  ;;  %v1089_v50 = vmul.f32 %v1088_v46, %v2089_v57  ;;  %v448_v52 = vmul.f32 %v447_v48, %v2143_v47  ;;  %v959_v53 = vmul.f32 %v958_v51, %v2089_v57 }
  0xe8   : > { %v470_v56 = vmul.f32 %v469_v54, %v2143_v47  ;;  %v426_v58 = vmul.f32 %v425_v55, %v2143_v47  ;;  %v436_v60 = vstv %s1541_s10  ;;  %v575_v61 = vmul.f32 %v574_v59, %v2143_v47  ;;  %s1571_s10 = sld [smem:[#allocation5 + $0x1e]] }
  0xe9   : > { %v437_v62 = vmul.f32 %v436_v60, %v2143_v47  ;;  %v584_v63 = vstv %s1556_s11  ;;  %v458_v0 = vstv %s1543_s24  ;;  %v480_v4 = vstv %s1545_s14  ;;  %s1569_s11 = sld [smem:[#allocation5 + $0x10]] }
  0xea   : > { %651 = vrot.lane.b32.xlu1 %v649_v2, %s1897_s23  ;;  %781 = vrot.lane.b32.xlu0 %v779_v3, %s1896_s27  ;;  %v585_v1 = vmul.f32 %v584_v63, %v2143_v47  ;;  %v459_v2 = vmul.f32 %v458_v0, %v2143_v47  ;;  %v844_v3 = vstv %s1582_s12  ;;  %v564_v8 = vstv %s1554_s30  ;;  %s1597_s24 = sld [smem:[#allocation5 + $0x12]] }
  0xeb   : > { %v845_v5 = vmul.f32 %v844_v3, %v2143_v47  ;;  %s1557_s12 = sld [smem:[#allocation5 + $0x1d]] }
  0xec   : > { %v704_v12 = vstv %s1568_s9  ;;  %s1559_s14 = sld [smem:[#allocation5 + $0x2b]] }
  0xed   : > { %s1585_s30 = sld [smem:[#allocation5 + $0x1f]] }
  0xee   : > { %911 = vrot.lane.b32.xlu1 %v909_v6, %s1895_s13  ;;  %661 = vrot.lane.b32.xlu0 %v659_v7, %s1898_s8  ;;  %v481_v6 = vmul.f32 %v480_v4, %v2143_v47  ;;  %v724_v7 = vstv %s1570_s29  ;;  %s1583_s29 = sld [smem:[#allocation5 + $0x11]] }
  0xef   : > { %v725_v9 = vmul.f32 %v724_v7, %v2143_v47  ;;  %v714_v16 = vstv %s1569_s11  ;;  %s1611_s9 = sld [smem:[#allocation5 + $0x13]] }
  0xf0   : > { %s1573_s11 = sld [smem:[#allocation5 + $0x2c]] }
  0xf1   : > { %v594_v20 = vstv %s1557_s12  ;;  %s1599_s12 = sld [smem:[#allocation5 + $0x20]] }
  0xf2   : > { %791 = vrot.lane.b32.xlu1 %v789_v10, %s1897_s23  ;;  %921 = vrot.lane.b32.xlu0 %v919_v11, %s1896_s27  ;;  %v565_v10 = vmul.f32 %v564_v8, %v2143_v47  ;;  %v984_v11 = vstv %s1596_s7  ;;  %s1558_s7 = sld [smem:[#allocation5 + $0x24]] }
  0xf3   : > { %v985_v13 = vmul.f32 %v984_v11, %v2143_v47 }
  0xf4   : > { %v854_v24 = vstv %s1583_s29  ;;  %s1625_s29 = sld [smem:[#allocation5 + $0x14]] }
  0xf6   : > { %1051 = vrot.lane.b32.xlu1 %v1049_v14, %s1895_s13  ;;  %801 = vrot.lane.b32.xlu0 %v799_v15, %s1898_s8  ;;  %v705_v14 = vmul.f32 %v704_v12, %v2143_v47  ;;  %v734_v15 = vstv %s1571_s10  ;;  %s1584_s10 = sld [smem:[#allocation5 + $0x18]] }
  0xf7   : > { %v735_v17 = vmul.f32 %v734_v15, %v2143_v47 }
  0xf8   : > { %v604_v28 = vstv %s1558_s7  ;;  %s1587_s7 = sld [smem:[#allocation5 + $0x2d]] }
  0xfa   : > { %671 = vrot.lane.b32.xlu1 %v669_v18, %s1899_s5  ;;  %1061 = vrot.lane.b32.xlu0 %v1059_v19, %s1896_s27  ;;  %v715_v18 = vmul.f32 %v714_v16, %v2143_v47  ;;  %v994_v19 = vstv %s1597_s24  ;;  %s1610_s24 = sld [smem:[#allocation5 + $0xc]] }
  0xfb   : > { %v995_v21 = vmul.f32 %v994_v19, %v2143_v47 }
  0xfc   : > { %v864_v32 = vstv %s1584_s10  ;;  %s1613_s10 = sld [smem:[#allocation5 + $0x21]] }
  0xfe   : > { %931 = vrot.lane.b32.xlu1 %v929_v22, %s1897_s23  ;;  %681 = vrot.lane.b32.xlu0 %v679_v23, %s1900_s25  ;;  %v595_v22 = vmul.f32 %v594_v20, %v2143_v47  ;;  %v614_v23 = vstv %s1559_s14  ;;  %s1572_s14 = sld [smem:[#allocation5 + $0x25]] }
  0xff   : > { %v615_v25 = vmul.f32 %v614_v23, %v2143_v47 }
 0x100   : > { %v1124_v36 = vstv %s1610_s24  ;;  %s1601_s24 = sld [smem:[#allocation5 + $0x2e]] }
 0x102   : > { %1191 = vrot.lane.b32.xlu1 %v1189_v26, %s1895_s13  ;;  %941 = vrot.lane.b32.xlu0 %v939_v27, %s1898_s8  ;;  %v855_v26 = vmul.f32 %v854_v24, %v2143_v47  ;;  %v874_v27 = vstv %s1585_s30  ;;  %s1598_s30 = sld [smem:[#allocation5 + $0x19]]  ;;  %v1154_v55 = vstv %s1613_s10 }
 0x103   : > { %v875_v29 = vmul.f32 %v874_v27, %v2143_v47  ;;  %v1155_v60 = vmul.f32 %v1154_v55, %v2143_v47  ;;  %s1633_s10 = sld [smem:[#allocation5 + $0x4c]] }
 0x104   : > { %v744_v40 = vstv %s1572_s14  ;;  %s1627_s14 = sld [smem:[#allocation5 + $0x22]] }
 0x106   : > { %811 = vrot.lane.b32.xlu1 %v809_v30, %s1899_s5  ;;  %1201 = vrot.lane.b32.xlu0 %v1199_v31, %s1896_s27  ;;  %v605_v30 = vmul.f32 %v604_v28, %v2143_v47  ;;  %v1134_v31 = vstv %s1611_s9  ;;  %s1624_s9 = sld [smem:[#allocation5 + $0xd]] }
 0x107   : > { %v1135_v33 = vmul.f32 %v1134_v31, %v2143_v47 }
 0x108   : > { %v1004_v45 = vstv %s1598_s30  ;;  %s1615_s30 = sld [smem:[#allocation5 + $0x2f]] }
 0x109   : > { %v1005_v48 = vmul.f32 %v1004_v45, %v2143_v47 }
 0x10a   : > { %1071 = vrot.lane.b32.xlu1 %v1069_v34, %s1897_s23  ;;  %821 = vrot.lane.b32.xlu0 %v819_v35, %s1900_s25  ;;  %v865_v34 = vmul.f32 %v864_v32, %v2143_v47  ;;  %v754_v35 = vstv %s1573_s11  ;;  %s1586_s11 = sld [smem:[#allocation5 + $0x26]]  ;;  %v1294_v4 = vstv %s1627_s14 }
 0x10b   : > { %v755_v37 = vmul.f32 %v754_v35, %v2143_v47  ;;  %v1295_v8 = vmul.f32 %v1294_v4, %v2143_v47  ;;  %s1622_s14 = sld [smem:[#allocation5 + $0x60]] }
 0x10e   : > { %1331 = vrot.lane.b32.xlu1 %v1329_v38, %s1895_s13  ;;  %1081 = vrot.lane.b32.xlu0 %v1079_v39, %s1898_s8  ;;  %v1125_v38 = vmul.f32 %v1124_v36, %v2143_v47  ;;  %v1014_v39 = vstv %s1599_s12  ;;  %s1612_s12 = sld [smem:[#allocation5 + $0x1a]] }
 0x10f   : > { %v1015_v42 = vmul.f32 %v1014_v39, %v2143_v47 }
 0x112   : > { %951 = vrot.lane.b32.xlu1 %v949_v43, %s1899_s5  ;;  %1341 = vrot.lane.b32.xlu0 %v1339_v44, %s1896_s27  ;;  %v745_v43 = vmul.f32 %v744_v40, %v2143_v47  ;;  %v1274_v44 = vstv %s1625_s29  ;;  %s1600_s29 = sld [smem:[#allocation5 + $0x27]] }
 0x113   : > { %v1275_v46 = vmul.f32 %v1274_v44, %v2143_v47 }
 0x114   : > { %v1144_v63 = vstv %s1612_s12  ;;  %s1620_s12 = sld [smem:[#allocation5 + $0x52]] }
 0x115   : > { %v1145_v3 = vmul.f32 %v1144_v63, %v2143_v47 }
 0x116   : > { %1211 = vrot.lane.b32.xlu1 %v1209_v49, %s1897_s23  ;;  %1091 = vrot.lane.b32.xlu0 %v1089_v50, %s1899_s5  ;;  %v894_v49 = vstv %s1587_s7  ;;  %v1264_v50 = vstv %s1624_s9  ;;  %s1626_s7 = sld [smem:[#allocation5 + $0x1b]] }
 0x117   : > { %v1265_v54 = vmul.f32 %v1264_v50, %v2143_v47  ;;  %s1614_s9 = sld [smem:[#allocation5 + $0x28]] }
 0x11a   : > { %961 = vrot.lane.b32.xlu1 %v959_v53, %s1900_s25  ;;  %450 = vrot.lane.b32.xlu0 %v448_v52, %s1897_s23  ;;  %v895_v53 = vmul.f32 %v894_v49, %v2143_v47 }
 0x11c   : > { %v1284_v11 = vstv %s1626_s7  ;;  %s1634_s7 = sld [smem:[#allocation5 + $0x53]] }
 0x11d   : > { %v1285_v15 = vmul.f32 %v1284_v11, %v2143_v47 }
 0x11e   : > { %472 = vrot.lane.b32.xlu0 %v470_v56, %s1899_s5  ;;  %428 = vrot.lane.b32.xlu1 %v426_v58, %s1895_s13  ;;  %v884_v56 = vstv %s1586_s11  ;;  %s1628_s11 = sld [smem:[#allocation5 + $0x29]] }
 0x122   : > { %577 = vrot.lane.b32.xlu0 %v575_v61, %s1896_s27  ;;  %439 = vrot.lane.b32.xlu1 %v437_v62, %s1896_s27  ;;  %v885_v61 = vmul.f32 %v884_v56, %v2143_v47  ;;  %v1034_v62 = vstv %s1601_s24  ;;  %s1621_s24 = sld [smem:[#allocation5 + $0x59]] }
 0x124   : > { %v1304_v23 = vstv %s1628_s11  ;;  %s1548_s11 = sld [smem:[#allocation5 + $0x3f]] }
 0x125   : > { %v1305_v27 = vmul.f32 %v1304_v23, %v2143_v47 }
 0x126   : > { %587 = vrot.lane.b32.xlu0 %v585_v1, %s1897_s23  ;;  %461 = vrot.lane.b32.xlu1 %v459_v2, %s1898_s8  ;;  %v1035_v2 = vmul.f32 %v1034_v62, %v2143_v47 }
 0x128   : > { %v1228_v28 = vstv %s1621_s24  ;;  %s1550_s24 = sld [smem:[#allocation5 + $0x4d]] }
 0x129   : > { %v1229_v32 = vmul.f32 %v1228_v28, %v2089_v57 }
 0x12a   : > { %847 = vrot.lane.b32.xlu0 %v845_v5, %s1895_s13  ;;  %483 = vrot.lane.b32.xlu1 %v481_v6, %s1900_s25  ;;  %v1024_v5 = vstv %s1600_s29  ;;  %s1608_s29 = sld [smem:[#allocation5 + $0x5f]] }
 0x12e   : > { %727 = vrot.lane.b32.xlu0 %v725_v9, %s1897_s23  ;;  %567 = vrot.lane.b32.xlu1 %v565_v10, %s1895_s13  ;;  %v1025_v9 = vmul.f32 %v1024_v5, %v2143_v47  ;;  %v1174_v10 = vstv %s1615_s30  ;;  %s1636_s30 = sld [smem:[#allocation5 + $0x61]] }
 0x130   : > { %v1098_v35 = vstv %s1608_s29  ;;  %s2348_s29 = sld [smem:[#allocation5 + $0x34]] }
 0x131   : > { %v1099_v39 = vmul.f32 %v1098_v35, %v2089_v57 }
 0x132   : > { %987 = vrot.lane.b32.xlu0 %v985_v13, %s1895_s13  ;;  %707 = vrot.lane.b32.xlu1 %v705_v14, %s1895_s13  ;;  %v1175_v14 = vmul.f32 %v1174_v10, %v2143_v47 }
 0x134   : > { %v1378_v40 = vstv %s1636_s30  ;;  %s2351_s30 = sld [smem:[#allocation5 + $0x35]] }
 0x135   : > { %v1379_v45 = vmul.f32 %v1378_v40, %v2089_v57 }
 0x136   : > { %737 = vrot.lane.b32.xlu0 %v735_v17, %s1898_s8  ;;  %717 = vrot.lane.b32.xlu1 %v715_v18, %s1896_s27  ;;  %v1164_v17 = vstv %s1614_s9  ;;  %s1635_s9 = sld [smem:[#allocation5 + $0x5a]] }
 0x13a   : > { %997 = vrot.lane.b32.xlu0 %v995_v21, %s1896_s27  ;;  %597 = vrot.lane.b32.xlu1 %v595_v22, %s1898_s8  ;;  %v1165_v21 = vmul.f32 %v1164_v17, %v2143_v47  ;;  %v1348_v22 = vstv %s1633_s10  ;;  %s1551_s10 = sld [smem:[#allocation5 + $0x54]] }
 0x13c   : > { %v1368_v49 = vstv %s1635_s9  ;;  %s2359_s9 = sld [smem:[#allocation5 + $0x4]] }
 0x13d   : > { %v1369_v55 = vmul.f32 %v1368_v49, %v2089_v57 }
 0x13e   : > { %617 = vrot.lane.b32.xlu0 %v615_v25, %s1900_s25  ;;  %857 = vrot.lane.b32.xlu1 %v855_v26, %s1896_s27  ;;  %v1349_v26 = vmul.f32 %v1348_v22, %v2089_v57 }
 0x140   : > { %v535_v56 = vstv %s1551_s10  ;;  %s2363_s10 = sld [smem:[#allocation5 + $0x5]] }
 0x141   : > { %v536_v63 = vmul.f32 %v535_v56, %v2089_v57 }
 0x142   : > { %877 = vrot.lane.b32.xlu0 %v875_v29, %s1898_s8  ;;  %607 = vrot.lane.b32.xlu1 %v605_v30, %s1899_s5  ;;  %v1218_v29 = vstv %s1620_s12  ;;  %s1552_s12 = sld [smem:[#allocation5 + $0x5b]] }
 0x146   : > { %1137 = vrot.lane.b32.xlu0 %v1135_v33, %s1896_s27  ;;  %867 = vrot.lane.b32.xlu1 %v865_v34, %s1897_s23  ;;  %v1219_v33 = vmul.f32 %v1218_v29, %v2089_v57  ;;  %v1238_v34 = vstv %s1622_s14  ;;  %s2346_s14 = sld [smem:[#allocation5 + $0x33]] }
 0x14a   : > { %757 = vrot.lane.b32.xlu0 %v755_v37, %s1900_s25  ;;  %1127 = vrot.lane.b32.xlu1 %v1125_v38, %s1895_s13  ;;  %v1239_v38 = vmul.f32 %v1238_v34, %v2089_v57 }
 0x14e   : > { %1017 = vrot.lane.b32.xlu0 %v1015_v42, %s1898_s8  ;;  %747 = vrot.lane.b32.xlu1 %v745_v43, %s1899_s5  ;;  %v1358_v42 = vstv %s1634_s7  ;;  %s2355_s7 = sld [smem:[#allocation5 + $0x36]] }
 0x152   : > { %1277 = vrot.lane.b32.xlu0 %v1275_v46, %s1896_s27  ;;  %1007 = vrot.lane.b32.xlu1 %v1005_v48, %s1897_s23  ;;  %v1359_v46 = vmul.f32 %v1358_v42, %v2089_v57 }
 0x154   : > { %v2209_v51 = vpop.permute.xlu1 %631  ;;  %v2211_v52 = vpop.permute.xlu0 %498 }
 0x156   : > { %897 = vrot.lane.b32.xlu0 %v895_v53, %s1900_s25  ;;  %1267 = vrot.lane.b32.xlu1 %v1265_v54, %s1895_s13  ;;  %s1629_s13 = sld [smem:[#allocation5 + $0x30]] }
 0x158   : > { %v2217_v58 = vpop.permute.xlu1 %771  ;;  %v2219_v59 = vpop.permute.xlu0 %641 }
 0x15a   : > { %1157 = vrot.lane.b32.xlu0 %v1155_v60, %s1898_s8  ;;  %887 = vrot.lane.b32.xlu1 %v885_v61, %s1899_s5  ;;  %v505_v60 = vstv %s1548_s11  ;;  %s2367_s11 = sld [smem:[#allocation5 + $0x6]] }
 0x15c   : > { %v2225_v0 = vpop.permute.xlu1 %651  ;;  %v2227_v1 = vpop.permute.xlu0 %781  ;;  %v1314_v16 = vstv %s1629_s13  ;;  %s1549_s13 = sld [smem:[#allocation5 + $0x46]] }
 0x15d   : > { %v1315_v20 = vmul.f32 %v1314_v16, %v2143_v47 }
 0x15e   : > { %1037 = vrot.lane.b32.xlu0 %v1035_v2, %s1900_s25  ;;  %1147 = vrot.lane.b32.xlu1 %v1145_v3, %s1897_s23  ;;  %v506_v2 = vmul.f32 %v505_v60, %v2089_v57  ;;  %v525_v3 = vstv %s1550_s24  ;;  %s1901_s24 = smov 127  }
 0x160   : > { %v2233_v6 = vpop.permute.xlu1 %911  ;;  %v2235_v7 = vpop.permute.xlu0 %661 }
 0x162   : > { %1297 = vrot.lane.b32.xlu0 %v1295_v8, %s1898_s8  ;;  %1027 = vrot.lane.b32.xlu1 %v1025_v9, %s1899_s5  ;;  %v515_v48 = vstv %s1549_s13  ;;  %v526_v8 = vmul.f32 %v525_v3, %v2089_v57  ;;  %v545_v9 = vstv %s1552_s12  ;;  %v500_v3 = vrot.slane %v2211_v52, 1  ;;  %s2357_s13 = sld [smem:[#allocation5 + $0x3]]  ;;  %s1902_s12 = smov 126  }
 0x163   : > { %v516_v54 = vmul.f32 %v515_v48, %v2089_v57 }
 0x164   : > { %v2241_v12 = vpop.permute.xlu1 %791  ;;  %v2243_v13 = vpop.permute.xlu0 %921 }
 0x166   : > { %1177 = vrot.lane.b32.xlu0 %v1175_v14, %s1900_s25  ;;  %1287 = vrot.lane.b32.xlu1 %v1285_v15, %s1897_s23  ;;  %v546_v14 = vmul.f32 %v545_v9, %v2089_v57 }
 0x168   : > { %v2249_v18 = vpop.permute.xlu1 %1051  ;;  %v2251_v19 = vpop.permute.xlu0 %801 }
 0x16a   : > { %1317 = vrot.lane.b32.xlu0 %v1315_v20, %s1900_s25  ;;  %1167 = vrot.lane.b32.xlu1 %v1165_v21, %s1899_s5 }
 0x16c   : > { %v2257_v24 = vpop.permute.xlu1 %671  ;;  %v2259_v25 = vpop.permute.xlu0 %1061 }
 0x16e   : > { %1351 = vrot.lane.b32.xlu0 %v1349_v26, %s1897_s23  ;;  %1307 = vrot.lane.b32.xlu1 %v1305_v27, %s1899_s5 }
 0x170   : > { %v2265_v30 = vpop.permute.xlu1 %931  ;;  %v2267_v31 = vpop.permute.xlu0 %681 }
 0x172   : > { %1231 = vrot.lane.b32.xlu0 %v1229_v32, %s1899_s5  ;;  %1221 = vrot.lane.b32.xlu1 %v1219_v33, %s1898_s8 }
 0x174   : > { %v2273_v36 = vpop.permute.xlu1 %1191  ;;  %v2275_v37 = vpop.permute.xlu0 %941 }
 0x176   : > { %1241 = vrot.lane.b32.xlu0 %v1239_v38, %s1900_s25  ;;  %1101 = vrot.lane.b32.xlu1 %v1099_v39, %s1900_s25 }
 0x178   : > { %v2281_v43 = vpop.permute.xlu1 %811  ;;  %v2283_v44 = vpop.permute.xlu0 %1201 }
 0x17a   : > { %1381 = vrot.lane.b32.xlu0 %v1379_v45, %s1900_s25  ;;  %1361 = vrot.lane.b32.xlu1 %v1359_v46, %s1898_s8 }
 0x17c   : > { %v2289_v50 = vpop.permute.xlu1 %1071  ;;  %v2291_v53 = vpop.permute.xlu0 %821 }
 0x17e   : > { %518 = vrot.lane.b32.xlu0 %v516_v54, %s1897_s23  ;;  %1371 = vrot.lane.b32.xlu1 %v1369_v55, %s1899_s5  ;;  %s420_s23 = sld [smem:[#allocation5]] }
 0x180   : > { %v2297_v61 = vpop.permute.xlu1 %1331  ;;  %v2299_v62 = vpop.permute.xlu0 %1081 }
 0x182   : > { %538 = vrot.lane.b32.xlu0 %v536_v63, %s1899_s5  ;;  %508 = vrot.lane.b32.xlu1 %v506_v2, %s1896_s27  ;;  %s1546_s27 = sld [smem:[#allocation5 + $0x31]] }
 0x183   : > { %s1567_s5 = sld [smem:[#allocation5 + $0x2]] }
 0x184   : > { %v2305_v4 = vpop.permute.xlu1 %951  ;;  %v2307_v5 = vpop.permute.xlu0 %1341  ;;  %v421_v17 = vstv %s420_s23  ;;  %s2528_s23 = sld [smem:[#allocation5 + $0x37]] }
 0x185   : > { %2683 = vst [vmem:[#allocation18_spill] sm:$0xff] %v2307_v5  ;;  %v422_v23 = vmul.f32 %v421_v17, %v2143_v47  ;;  %v1260_v5 = vstv %s2367_s11 }
 0x186   : > { %528 = vrot.lane.b32.xlu1 %v526_v8, %s1898_s8  ;;  %s1553_s8 = sld [smem:[#allocation5 + $0x1]] }
 0x188   : > { %v2311_v10 = vpop.permute.xlu1 %1211  ;;  %v2313_v11 = vpop.permute.xlu0 %1091  ;;  %v491_v60 = vstv %s1546_s27  ;;  %s1903_s27 = smov 125  }
 0x189   : > { %v492_v9 = vmul.f32 %v491_v60, %v2089_v57 }
 0x18a   : > { %548 = vrot.lane.b32.xlu1 %v546_v14, %s1900_s25  ;;  %s2344_s25 = sld [smem:[#allocation5 + $0x32]] }
 0x18c   : > { %v2317_v15 = vpop.permute.xlu1 %961  ;;  %v451_v16 = vpop.permute.xlu0 %450 }
 0x18d   : > { %v452_v32 = vrot.slane %v451_v16, 1 }
 0x18f   : > { %v454_v40 = vsel %vm453_vm10, %v451_v16, %v452_v32 }
 0x190   : > { %v429_v20 = vpop.permute.xlu1 %428  ;;  %v473_v21 = vpop.permute.xlu0 %472 }
 0x191   : > { %v430_v22 = vrot.slane %v429_v20, 1  ;;  %v474_v42 = vrot.slane %v473_v21, 1 }
 0x193   : > { %v432_v26 = vsel %vm431_vm8, %v429_v20, %v430_v22  ;;  %v476_v56 = vsel %vm475_vm12, %v473_v21, %v474_v42  ;;  %v501_v22 = vsel %vm431_vm8, %v2211_v52, %v500_v3 }
 0x194   : > { %v434_v27 = vadd.f32 %v432_v26, %v422_v23  ;;  %v440_v28 = vpop.permute.xlu1 %439  ;;  %v578_v29 = vpop.permute.xlu0 %577 }
 0x195   : > { %v441_v33 = vrot.slane %v440_v28, 1 }
 0x197   : > { %v443_v34 = vsel %vm442_vm9, %v440_v28, %v441_v33  ;;  %v560_v28 = vstv %s1553_s8  ;;  %s1904_s8 = smov 124  }
 0x198   : > { %v445_v35 = vadd.f32 %v443_v34, %v434_v27  ;;  %v462_v38 = vpop.permute.xlu1 %461  ;;  %v588_v39 = vpop.permute.xlu0 %587 }
 0x199   : > { %v463_v45 = vrot.slane %v462_v38, 1 }
 0x19a   : > { %v456_v46 = vadd.f32 %v454_v40, %v445_v35  ;;  %v561_v35 = vmul.f32 %v560_v28, %v2143_v47 }
 0x19b   : > { %v465_v48 = vsel %vm464_vm11, %v462_v38, %v463_v45  ;;  %v579_v38 = vrot.slane %v578_v29, 1 }
 0x19c   : > { %v467_v49 = vadd.f32 %v465_v48, %v456_v46  ;;  %v484_v54 = vpop.permute.xlu1 %483  ;;  %v2324_v55 = vpop.permute.xlu0 %847  ;;  %v589_v46 = vrot.slane %v588_v39, 1 }
 0x19d   : > { %v485_v63 = vrot.slane %v484_v54, 1  ;;  %v580_v52 = vsel %vm442_vm9, %v578_v29, %v579_v38 }
 0x19e   : > { %v478_v2 = vadd.f32 %v476_v56, %v467_v49 }
 0x19f   : > { %v487_v8 = vsel %vm486_vm13, %v484_v54, %v485_v63  ;;  %v590_v63 = vsel %vm453_vm10, %v588_v39, %v589_v46  ;;  %v904_v46 = vstv %s2348_s29 }
 0x1a0   : > { %v489_v14 = vadd.f32 %v487_v8, %v478_v2  ;;  %v568_v16 = vpop.permute.xlu1 %567  ;;  %v2330_v17 = vpop.permute.xlu0 %727  ;;  %v700_v2 = vstv %s1567_s5  ;;  %s1905_s5 = smov 123  }
 0x1a1   : > { %v569_v27 = vrot.slane %v568_v16, 1  ;;  %v701_v39 = vmul.f32 %v700_v2, %v2143_v47 }
 0x1a2   : > { %v493_v20 = vadd.f32 %v492_v9, %v489_v14 }
 0x1a3   : > { %v570_v34 = vsel %vm431_vm8, %v568_v16, %v569_v27 }
 0x1a4   : > { %v708_v21 = vpop.permute.xlu1 %707  ;;  %v2334_v23 = vpop.permute.xlu0 %987  ;;  %v2336_v26 = vadd.f32 %v501_v22, %v493_v20  ;;  %v572_v40 = vadd.f32 %v570_v34, %v561_v35  ;;  %v624_v34 = vstv %s2344_s25  ;;  %s1906_s25 = smov 122  }
 0x1a5   : > { %v709_v60 = vrot.slane %v708_v21, 1 }
 0x1a6   : > { %2684 = vst [vmem:[#allocation19_spill] sm:$0xff] %v2336_v26  ;;  %v582_v49 = vadd.f32 %v580_v52, %v572_v40 }
 0x1a7   : > { %v710_v16 = vsel %vm431_vm8, %v708_v21, %v709_v60  ;;  %v764_v21 = vstv %s2346_s14 }
 0x1a8   : > { %v718_v32 = vpop.permute.xlu1 %717  ;;  %v2338_v33 = vpop.permute.xlu0 %737  ;;  %v592_v8 = vadd.f32 %v590_v63, %v582_v49  ;;  %v712_v38 = vadd.f32 %v710_v16, %v701_v39  ;;  %v840_v49 = vstv %s2357_s13  ;;  %v980_v63 = vstv %s2359_s9  ;;  %s1539_s13 = sshll.u32 %s2061_s28, 1  ;;  %s1644_s9 = sshll.u32 %s1879_s18, 5 }
 0x1a9   : > { %v719_v29 = vrot.slane %v718_v32, 1  ;;  %v653_v39 = vrot.slane %v2225_v0, 1 }
 0x1ab   : > { %v720_v28 = vsel %vm442_vm9, %v718_v32, %v719_v29  ;;  %v729_v32 = vrot.slane %v2330_v17, 1  ;;  %v625_v29 = vmul.f32 %v624_v34, %v2089_v57  ;;  %v739_v34 = vrot.slane %v2338_v33, 1 }
 0x1ac   : > { %v598_v42 = vpop.permute.xlu1 %597  ;;  %v2342_v45 = vpop.permute.xlu0 %997  ;;  %v722_v2 = vadd.f32 %v720_v28, %v712_v38  ;;  %v2400_v28 = vmul.f32 %v980_v63, %v2143_v47  ;;  %v663_v38 = vrot.slane %v2235_v7, 1  ;;  %v673_v63 = vrot.slane %v2257_v24, 1 }
 0x1ad   : > { %v599_v48 = vrot.slane %v598_v42, 1 }
 0x1af   : > { %v600_v3 = vsel %vm464_vm11, %v598_v42, %v599_v48  ;;  %v633_v48 = vrot.slane %v2209_v51, 1 }
 0x1b0   : > { %v2353_v54 = vpop.permute.xlu1 %857  ;;  %v618_v56 = vpop.permute.xlu0 %617  ;;  %v602_v27 = vadd.f32 %v600_v3, %v592_v8  ;;  %v643_v8 = vrot.slane %v2219_v59, 1 }
 0x1b1   : > { %v619_v20 = vrot.slane %v618_v56, 1 }
 0x1b3   : > { %v620_v60 = vsel %vm486_vm13, %v618_v56, %v619_v20  ;;  %v634_v56 = vsel %vm431_vm8, %v2209_v51, %v633_v48  ;;  %v730_v20 = vsel %vm453_vm10, %v2330_v17, %v729_v32  ;;  %v849_v51 = vrot.slane %v2324_v55, 1 }
 0x1b4   : > { %v608_v9 = vpop.permute.xlu1 %607  ;;  %v2365_v14 = vpop.permute.xlu0 %877  ;;  %v765_v48 = vmul.f32 %v764_v21, %v2089_v57  ;;  %v2412_v17 = vmul.f32 %v1260_v5, %v2143_v47  ;;  %v654_v32 = vsel %vm453_vm10, %v2225_v0, %v653_v39  ;;  %v859_v21 = vrot.slane %v2353_v54, 1 }
 0x1b5   : > { %v609_v22 = vrot.slane %v608_v9, 1  ;;  %v773_v5 = vrot.slane %v2217_v58, 1  ;;  %v664_v0 = vsel %vm464_vm11, %v2235_v7, %v663_v38  ;;  %v793_v38 = vrot.slane %v2241_v12, 1 }
 0x1b7   : > { %v610_v35 = vsel %vm475_vm12, %v608_v9, %v609_v22  ;;  %v1120_v9 = vstv %s2363_s10  ;;  %s254_s10 = scalar_lea.vmem [#allocation12], %s1539_s13 }
 0x1b8   : > { %v612_v40 = vadd.f32 %v610_v35, %v602_v27  ;;  %v2374_v42 = vpop.permute.xlu1 %867  ;;  %v2376_v52 = vpop.permute.xlu0 %1137  ;;  %v841_v27 = vmul.f32 %v840_v49, %v2143_v47  ;;  %s1421_s11 = sshll.u32 %s254_s10, 4  ;;  %s1422_s11 = int_to_ptr.vmem [resolvable:$true] %s1421_s11 }
 0x1ba   : > { %v622_v3 = vadd.f32 %v620_v60, %v612_v40  ;;  %v732_v40 = vadd.f32 %v730_v20, %v722_v2  ;;  %v2405_v60 = vmul.f32 %v1120_v9, %v2143_v47  ;;  %v2420_v9 = vmul.f32 %v904_v46, %v2089_v57 }
 0x1bb   : > { %v683_v20 = vrot.slane %v2267_v31, 1  ;;  %v850_v57 = vsel %vm431_vm8, %v2324_v55, %v849_v51  ;;  %v869_v46 = vrot.slane %v2374_v42, 1  ;;  %v860_v55 = vsel %vm442_vm9, %v2353_v54, %v859_v21 }
 0x1bc   : > { %v626_v35 = vadd.f32 %v625_v29, %v622_v3  ;;  %v2392_v41 = vpop.permute.xlu1 %1127  ;;  %v758_v26 = vpop.permute.xlu0 %757  ;;  %v644_v29 = vsel %vm442_vm9, %v2219_v59, %v643_v8  ;;  %v740_v59 = vsel %vm464_vm11, %v2338_v33, %v739_v34  ;;  %v783_v34 = vrot.slane %v2227_v1, 1 }
 0x1bd   : > { %v759_v8 = vrot.slane %v758_v26, 1  ;;  %v742_v39 = vadd.f32 %v740_v59, %v732_v40  ;;  %v674_v40 = vsel %vm475_vm12, %v2257_v24, %v673_v63  ;;  %v870_v24 = vsel %vm453_vm10, %v2374_v42, %v869_v46 }
 0x1be   : > { %v636_v49 = vadd.f32 %v634_v56, %v626_v35  ;;  %v999_v54 = vrot.slane %v2342_v45, 1  ;;  %v794_v46 = vsel %vm453_vm10, %v2241_v12, %v793_v38 }
 0x1bf   : > { %v760_v51 = vsel %vm486_vm13, %v758_v26, %v759_v8 }
 0x1c0   : > { %v646_v2 = vadd.f32 %v644_v29, %v636_v49  ;;  %v748_v3 = vpop.permute.xlu1 %747  ;;  %v2417_v35 = vpop.permute.xlu0 %1017  ;;  %v913_v49 = vrot.slane %v2233_v6, 1  ;;  %v1000_v12 = vsel %vm442_vm9, %v2342_v45, %v999_v54  ;;  %v823_v45 = vrot.slane %v2291_v53, 1 }
 0x1c1   : > { %v749_v47 = vrot.slane %v748_v3, 1 }
 0x1c2   : > { %v656_v56 = vadd.f32 %v654_v32, %v646_v2  ;;  %v923_v32 = vrot.slane %v2243_v13, 1  ;;  %v852_v2 = vadd.f32 %v850_v57, %v841_v27  ;;  %v784_v57 = vsel %vm442_vm9, %v2227_v1, %v783_v34 }
 0x1c3   : > { %v750_v33 = vsel %vm475_vm12, %v748_v3, %v749_v47  ;;  %v803_v47 = vrot.slane %v2251_v19, 1  ;;  %v1053_v1 = vrot.slane %v2249_v18, 1 }
 0x1c4   : > { %v752_v29 = vadd.f32 %v750_v33, %v742_v39  ;;  %v1008_v22 = vpop.permute.xlu1 %1007  ;;  %v2435_v16 = vpop.permute.xlu0 %1277  ;;  %v666_v7 = vadd.f32 %v664_v0, %v656_v56  ;;  %v684_v0 = vsel %vm486_vm13, %v2267_v31, %v683_v20  ;;  %v989_v39 = vrot.slane %v2334_v23, 1  ;;  %v2456_v20 = vld [vmem:[#allocation4 + $0x1] ss:$2 sm:$0x7] }
 0x1c5   : > { %v862_v63 = vadd.f32 %v860_v55, %v852_v2  ;;  %v774_v56 = vsel %vm431_vm8, %v2217_v58, %v773_v5  ;;  %v879_v31 = vrot.slane %v2365_v14, 1  ;;  %v2685_v33 = vstv %s2351_s30  ;;  %s1396_s30 = sld [smem:[#allocation10]] }
 0x1c6   : > { %v762_v3 = vadd.f32 %v760_v51, %v752_v29  ;;  %v676_v59 = vadd.f32 %v674_v40, %v666_v7  ;;  %v2461_v42 = vmul.f32 %v2456_v20, %v2685_v33  ;;  %v924_v58 = vsel %vm442_vm9, %v2243_v13, %v923_v32 }
 0x1c7   : > { %v872_v29 = vadd.f32 %v870_v24, %v862_v63  ;;  %v990_v5 = vsel %vm431_vm8, %v2334_v23, %v989_v39  ;;  %v1009_v34 = vrot.slane %v1008_v22, 1  ;;  %v804_v40 = vsel %vm464_vm11, %v2251_v19, %v803_v47 }
 0x1c8   : > { %v766_v26 = vadd.f32 %v765_v48, %v762_v3  ;;  %v1268_v21 = vpop.permute.xlu1 %1267  ;;  %v898_v8 = vpop.permute.xlu0 %897  ;;  %v686_v27 = vadd.f32 %v684_v0, %v676_v59  ;;  %v914_v48 = vsel %vm431_vm8, %v2233_v6, %v913_v49  ;;  %v813_v6 = vrot.slane %v2281_v43, 1 }
 0x1c9   : > { %v880_v13 = vsel %vm464_vm11, %v2365_v14, %v879_v31  ;;  %v1129_v51 = vrot.slane %v2392_v41, 1  ;;  %v899_v32 = vrot.slane %v898_v8, 1  ;;  %v1063_v2 = vrot.slane %v2259_v25, 1 }
 0x1ca   : > { %v776_v7 = vadd.f32 %v774_v56, %v766_v26  ;;  %688 = vrot.lane.b32.xlu0 %v686_v27, %s1901_s24  ;;  %v992_v19 = vadd.f32 %v990_v5, %v2400_v28  ;;  %v882_v3 = vadd.f32 %v880_v13, %v872_v29  ;;  %v933_v47 = vrot.slane %v2265_v30, 1 }
 0x1cb   : > { %v1010_v0 = vsel %vm453_vm10, %v1008_v22, %v1009_v34  ;;  %v814_v14 = vsel %vm475_vm12, %v2281_v43, %v813_v6  ;;  %v1130_v28 = vsel %vm431_vm8, %v2392_v41, %v1129_v51  ;;  %v1019_v56 = vrot.slane %v2417_v35, 1 }
 0x1cc   : > { %v786_v49 = vadd.f32 %v784_v57, %v776_v7  ;;  %v888_v38 = vpop.permute.xlu1 %887  ;;  %v2477_v55 = vpop.permute.xlu0 %1157  ;;  %v1002_v24 = vadd.f32 %v1000_v12, %v992_v19  ;;  %v1269_v57 = vrot.slane %v1268_v21, 1  ;;  %v900_v31 = vsel %vm486_vm13, %v898_v8, %v899_v32 }
 0x1cd   : > { %v889_v23 = vrot.slane %v888_v38, 1  ;;  %v1054_v22 = vsel %vm431_vm8, %v2249_v18, %v1053_v1  ;;  %v2498_v43 = vsel %vm442_vm9, %v2259_v25, %v1063_v2  ;;  %v824_v7 = vsel %vm486_vm13, %v2291_v53, %v823_v45 }
 0x1ce   : > { %v796_v59 = vadd.f32 %v794_v46, %v786_v49  ;;  %v1012_v33 = vadd.f32 %v1010_v0, %v1002_v24  ;;  %v1139_v41 = vrot.slane %v2376_v52, 1  ;;  %v934_v34 = vsel %vm453_vm10, %v2265_v30, %v933_v47 }
 0x1cf   : > { %v890_v39 = vsel %vm475_vm12, %v888_v38, %v889_v23  ;;  %v1132_v8 = vadd.f32 %v1130_v28, %v2405_v60  ;;  %v1020_v25 = vsel %vm464_vm11, %v2417_v35, %v1019_v56  ;;  %v1270_v12 = vsel %vm431_vm8, %v1268_v21, %v1269_v57 }
 0x1d0   : > { %v892_v54 = vadd.f32 %v890_v39, %v882_v3  ;;  %v1148_v63 = vpop.permute.xlu1 %1147  ;;  %v1038_v26 = vpop.permute.xlu0 %1037  ;;  %v806_v27 = vadd.f32 %v804_v40, %v796_v59  ;;  %v943_v38 = vrot.slane %v2275_v37, 1  ;;  %v953_v13 = vrot.slane %v2305_v4, 1 }
 0x1d1   : > { %v1149_v5 = vrot.slane %v1148_v63, 1  ;;  %v1039_v49 = vrot.slane %v1038_v26, 1  ;;  %v1022_v30 = vadd.f32 %v1020_v25, %v1012_v33  ;;  %v1140_v60 = vsel %vm442_vm9, %v2376_v52, %v1139_v41 }
 0x1d2   : > { %v902_v46 = vadd.f32 %v900_v31, %v892_v54  ;;  %v816_v29 = vadd.f32 %v814_v14, %v806_v27  ;;  %v1272_v21 = vadd.f32 %v1270_v12, %v2412_v17  ;;  %v1142_v2 = vadd.f32 %v1140_v60, %v1132_v8 }
 0x1d3   : > { %v1150_v32 = vsel %vm453_vm10, %v1148_v63, %v1149_v5  ;;  %v1159_v47 = vrot.slane %v2477_v55, 1  ;;  %v1040_v45 = vsel %vm486_vm13, %v1038_v26, %v1039_v49  ;;  %v944_v0 = vsel %vm464_vm11, %v2275_v37, %v943_v38 }
 0x1d4   : > { %v906_v18 = vadd.f32 %v2420_v9, %v902_v46  ;;  %v1028_v1 = vpop.permute.xlu1 %1027  ;;  %v1298_v40 = vpop.permute.xlu0 %1297  ;;  %v826_v6 = vadd.f32 %v824_v7, %v816_v29  ;;  %v1279_v9 = vrot.slane %v2435_v16, 1  ;;  %v1152_v39 = vadd.f32 %v1150_v32, %v1142_v2 }
 0x1d5   : > { %v1029_v53 = vrot.slane %v1028_v1, 1  ;;  %v1073_v17 = vrot.slane %v2289_v50, 1  ;;  %v954_v26 = vsel %vm475_vm12, %v2305_v4, %v953_v13  ;;  %v1160_v31 = vsel %vm464_vm11, %v2477_v55, %v1159_v47 }
 0x1d6   : > { %v916_v51 = vadd.f32 %v914_v48, %v906_v18  ;;  %828 = vrot.lane.b32.xlu1 %v826_v6, %s1902_s12  ;;  %v1193_v48 = vrot.slane %v2273_v36, 1  ;;  %v1280_v54 = vsel %vm442_vm9, %v2435_v16, %v1279_v9  ;;  %v1299_v33 = vrot.slane %v1298_v40, 1 }
 0x1d7   : > { %v1030_v35 = vsel %vm475_vm12, %v1028_v1, %v1029_v53  ;;  %v1282_v37 = vadd.f32 %v1280_v54, %v1272_v21  ;;  %v1162_v41 = vadd.f32 %v1160_v31, %v1152_v39  ;;  %v1074_v4 = vsel %vm453_vm10, %v2289_v50, %v1073_v17 }
 0x1d8   : > { %v926_v23 = vadd.f32 %v924_v58, %v916_v51  ;;  %v1032_v19 = vadd.f32 %v1030_v35, %v1022_v30  ;;  %v1288_v3 = vpop.permute.xlu1 %1287  ;;  %v1178_v59 = vpop.permute.xlu0 %1177  ;;  %v963_v58 = vrot.slane %v2317_v15, 1  ;;  %v1093_v55 = vrot.slane %v2313_v11, 1 }
 0x1d9   : > { %v1289_v52 = vrot.slane %v1288_v3, 1  ;;  %v1179_v46 = vrot.slane %v1178_v59, 1  ;;  %v1300_v12 = vsel %vm464_vm11, %v1298_v40, %v1299_v33  ;;  %v2686_v38 = vstv %s2355_s7  ;;  %s1637_s7 = sld [smem:[#allocation10 + $0x1]] }
 0x1da   : > { %v1042_v14 = vadd.f32 %v1040_v45, %v1032_v19  ;;  %v936_v24 = vadd.f32 %v934_v34, %v926_v23  ;;  %v964_v34 = vsel %vm486_vm13, %v2317_v15, %v963_v58  ;;  %v1185_v15 = vmul.f32 %v2456_v20, %v2686_v38 }
 0x1db   : > { %v1290_v63 = vsel %vm453_vm10, %v1288_v3, %v1289_v52  ;;  %v1180_v50 = vsel %vm486_vm13, %v1178_v59, %v1179_v46  ;;  %v1203_v60 = vrot.slane %v2283_v44, 1  ;;  %v1333_v32 = vrot.slane %v2297_v61, 1 }
 0x1dc   : > { %v1046_v27 = vadd.f32 %v2461_v42, %v1042_v14  ;;  %v1168_v28 = vpop.permute.xlu1 %1167  ;;  %v1318_v56 = vpop.permute.xlu0 %1317  ;;  %v946_v57 = vadd.f32 %v944_v0, %v936_v24  ;;  %v1292_v7 = vadd.f32 %v1290_v63, %v1282_v37  ;;  %v1083_v42 = vrot.slane %v2299_v62, 1  ;;  %v2687_v24 = vld [vmem:[#allocation18_spill] sm:$0xff] }
 0x1dd   : > { %v1169_v29 = vrot.slane %v1168_v28, 1  ;;  %v1319_v49 = vrot.slane %v1318_v56, 1  ;;  %v1194_v3 = vsel %vm431_vm8, %v2273_v36, %v1193_v48  ;;  %v1213_v59 = vrot.slane %v2311_v10, 1 }
 0x1de   : > { %v1056_v16 = vadd.f32 %v1054_v22, %v1046_v27  ;;  %v956_v5 = vadd.f32 %v954_v26, %v946_v57  ;;  %v1302_v51 = vadd.f32 %v1300_v12, %v1292_v7  ;;  %v1084_v9 = vsel %vm464_vm11, %v2299_v62, %v1083_v42 }
 0x1df   : > { %v1170_v8 = vsel %vm475_vm12, %v1168_v28, %v1169_v29  ;;  %v1094_v47 = vsel %vm475_vm12, %v2313_v11, %v1093_v55  ;;  %v1320_v62 = vsel %vm486_vm13, %v1318_v56, %v1319_v49  ;;  %v1204_v14 = vsel %vm442_vm9, %v2283_v44, %v1203_v60  ;;  %v2688_v60 = vld [vmem:[#allocation19_spill] sm:$0xff] }
 0x1e0   : > { %v1172_v18 = vadd.f32 %v1170_v8, %v1162_v41  ;;  %v1308_v1 = vpop.permute.xlu1 %1307  ;;  %v1352_v22 = vpop.permute.xlu0 %1351  ;;  %v966_v6 = vadd.f32 %v964_v34, %v956_v5  ;;  %v1066_v25 = vadd.f32 %v2498_v43, %v1056_v16  ;;  %v1324_v43 = vstv %s2528_s23  ;;  %s1419_s23 = scalar_lea.hbm %s2664_s4, %s1644_s9 }
 0x1e1   : > { %v1309_v53 = vrot.slane %v1308_v1, 1  ;;  %v1325_v45 = vmul.f32 %v2456_v20, %v1324_v43  ;;  %v1343_v17 = vrot.slane %v2687_v24, 1  ;;  %v1334_v36 = vsel %vm431_vm8, %v2297_v61, %v1333_v32 }
 0x1e2   : > { %v1182_v13 = vadd.f32 %v1180_v50, %v1172_v18  ;;  %968 = vrot.lane.b32.xlu0 %v966_v6, %s1903_s27  ;;  %v1076_v30 = vadd.f32 %v1074_v4, %v1066_v25  ;;  %v1214_v26 = vsel %vm453_vm10, %v2311_v10, %v1213_v59  ;;  %v1353_v20 = vrot.slane %v1352_v22, 1  ;;  %s1407_s27 = scalar_lea.sflag [#allocation7], %s2061_s28 }
 0x1e3   : > { %v1310_v40 = vsel %vm475_vm12, %v1308_v1, %v1309_v53  ;;  %v1344_v44 = vsel %vm442_vm9, %v2687_v24, %v1343_v17 }
 0x1e4   : > { %v1186_v35 = vadd.f32 %v1185_v15, %v1182_v13  ;;  %v1312_v21 = vadd.f32 %v1310_v40, %v1302_v51  ;;  %v1222_v23 = vpop.permute.xlu1 %1221  ;;  %v1232_v2 = vpop.permute.xlu0 %1231  ;;  %v1086_v19 = vadd.f32 %v1084_v9, %v1076_v30  ;;  %v1354_v7 = vsel %vm453_vm10, %v1352_v22, %v1353_v20 }
 0x1e5   : > { %v1223_v58 = vrot.slane %v1222_v23, 1  ;;  %v1233_v27 = vrot.slane %v1232_v2, 1 }
 0x1e6   : > { %v1322_v52 = vadd.f32 %v1320_v62, %v1312_v21  ;;  %v1196_v0 = vadd.f32 %v1194_v3, %v1186_v35  ;;  %v1096_v39 = vadd.f32 %v1094_v47, %v1086_v19  ;;  %v416_v47 = vld [vmem:[%s2662_s2] sm:$0x3] }
 0x1e7   : > { %v1224_v57 = vsel %vm464_vm11, %v1222_v23, %v1223_v58  ;;  %v1234_v10 = vsel %vm475_vm12, %v1232_v2, %v1233_v27  ;;  %vm556_vm14 = vcmp.ge.s32.totalorder %v416_v47, 2  ;;  %vm557_vm15 = vcmp.lt.s32.totalorder %v416_v47, 18 }
 0x1e8   : > { %v1326_v48 = vadd.f32 %v1325_v45, %v1322_v52  ;;  %v1206_v54 = vadd.f32 %v1204_v14, %v1196_v0  ;;  %v1102_v63 = vpop.permute.xlu1 %1101  ;;  %v1242_v11 = vpop.permute.xlu0 %1241  ;;  %vm417_vm1 = vcmp.ge.s32.totalorder %v416_v47, 3  ;;  %vm418_vm2 = vcmp.lt.s32.totalorder %v416_v47, 19  ;;  %vm2587_vm7 = vmand %vm556_vm14, %vm557_vm15 }
 0x1e9   : > { %v1103_v37 = vrot.slane %v1102_v63, 1  ;;  %v1243_v61 = vrot.slane %v1242_v11, 1  ;;  %vm696_vm4 = vcmp.ge.s32.totalorder %v416_v47, 1  ;;  %vm697_vm5 = vcmp.lt.s32.totalorder %v416_v47, 17  ;;  %vm2591_vm8 = vmand %vm417_vm1, %vm418_vm2 }
 0x1ea   : > { %v1336_v28 = vadd.f32 %v1334_v36, %v1326_v48  ;;  %v1216_v56 = vadd.f32 %v1214_v26, %v1206_v54  ;;  %vm977_vm14 = vcmp.lt.s32.totalorder %v416_v47, 15  ;;  %vm1111_vm15 = vcmask 1014784  }
 0x1eb   : > { %v1104_v31 = vsel %vm486_vm13, %v1102_v63, %v1103_v37  ;;  %v1244_v34 = vsel %vm486_vm13, %v1242_v11, %v1243_v61  ;;  %vm1116_vm1 = vcmp.ge.s32.totalorder %v416_v47, 4294967294  ;;  %vm1117_vm2 = vcmp.lt.s32.totalorder %v416_v47, 14 }
 0x1ec   : > { %v1346_v33 = vadd.f32 %v1344_v44, %v1336_v28  ;;  %v1226_v46 = vadd.f32 %v1224_v57, %v1216_v56  ;;  %v1106_v29 = vadd.f32 %v1104_v31, %v1096_v39  ;;  %v1362_v16 = vpop.permute.xlu1 %1361  ;;  %v1382_v42 = vpop.permute.xlu0 %1381 }
 0x1ed   : > { %v1363_v41 = vrot.slane %v1362_v16, 1  ;;  %v1383_v1 = vrot.slane %v1382_v42, 1 }
 0x1ee   : > { %v1356_v5 = vadd.f32 %v1354_v7, %v1346_v33  ;;  %v1236_v4 = vadd.f32 %v1234_v10, %v1226_v46  ;;  %1108 = vrot.lane.b32.xlu1 %v1106_v29, %s1904_s8  ;;  %s1799_s8 = scalar_lea.vmem %s1422_s11, 32 }
 0x1ef   : > { %v1364_v8 = vsel %vm464_vm11, %v1362_v16, %v1363_v41  ;;  %v1384_v50 = vsel %vm486_vm13, %v1382_v42, %v1383_v1  ;;  %p1800_p1 = scmp.ne.s32.totalorder %s1422_s11, %s1799_s8 }
 0x1f0   : > { %v1246_v55 = vadd.f32 %v1244_v34, %v1236_v4  ;;  %v1372_v18 = vpop.permute.xlu1 %1371  ;;  %v1366_v25 = vadd.f32 %v1364_v8, %v1356_v5  ;;  %v519_v15 = vpop.permute.xlu0 %518 }
 0x1f1   : > { %v1373_v6 = vrot.slane %v1372_v18, 1  ;;  %v520_v30 = vrot.slane %v519_v15, 1  ;;  %p1801_p4 = pnand %p1800_p1, %p2029_p0 }
 0x1f2   : > { %1248 = vrot.lane.b32.xlu0 %v1246_v55, %s1905_s5  ;;  %s1907_s5 = smov [#allocation12]  }
 0x1f3   : > { %v1374_v22 = vsel %vm475_vm12, %v1372_v18, %v1373_v6  ;;  %v521_v40 = vsel %vm453_vm10, %v519_v15, %v520_v30  ;;  %vm837_vm10 = vcmp.lt.s32.totalorder %v416_v47, 16  ;;  %v1397_v18 = vstv %s1396_s30  ;;  %p1802_p8 = pneg %p1801_p4  ;;  %s1803_s18 = sshll.u32 %s1907_s5, 4  ;;  %s1804_s18 = int_to_ptr.vmem [resolvable:$false] %s1803_s18 }
 0x1f4   : > { %v1376_v12 = vadd.f32 %v1374_v22, %v1366_v25  ;;  %v509_v53 = vpop.permute.xlu1 %508  ;;  %v539_v32 = vpop.permute.xlu0 %538  ;;  %v1400_v25 = vstv %s1637_s7  ;;  %p1806_p5 = scmp.lt.s32.totalorder %s1422_s11, %s1804_s18 }
 0x1f5   : > { %v510_v38 = vrot.slane %v509_v53, 1  ;;  %v540_v2 = vrot.slane %v539_v32, 1 }
 0x1f6   : > { %v1386_v49 = vadd.f32 %v1384_v50, %v1376_v12 }
 0x1f7   : > { %v511_v13 = vsel %vm442_vm9, %v509_v53, %v510_v38  ;;  %v541_v45 = vsel %vm475_vm12, %v539_v32, %v540_v2  ;;  %vm836_vm9 = vcmp.ge.s32.totalorder %v416_v47, 0  ;;  %vm2595_vm12 = vmand %vm696_vm4, %vm697_vm5  ;;  %vm1251_vm4 = vcmask 1006592  }
 0x1f8   : > { %1388 = vrot.lane.b32.xlu1 %v1386_v49, %s1906_s25  ;;  %v529_v51 = vpop.permute.xlu1 %528  ;;  %v513_v9 = vadd.f32 %v511_v13, %v2688_v60  ;;  %s1805_s25 = scalar_lea.vmem %s1804_s18, 64 }
 0x1f9   : > { %v530_v43 = vrot.slane %v529_v51, 1  ;;  %p1807_p11 = scmp.lt.s32.totalorder %s1805_s25, %s1799_s8 }
 0x1fa   : > { %v523_v35 = vadd.f32 %v521_v40, %v513_v9 }
 0x1fb   : > { %v531_v21 = vsel %vm464_vm11, %v529_v51, %v530_v43  ;;  %vm971_vm11 = vcmask 1022976   ;;  %p1808_p2 = por %p1807_p11, %p1806_p5 }
 0x1fc   : > { %v549_v23 = vpop.permute.xlu1 %548  ;;  %v533_v19 = vadd.f32 %v531_v21, %v523_v35 }
 0x1fd   : > { %v550_v59 = vrot.slane %v549_v23, 1  ;;  %p1809_p12 = pnand %p1808_p2, %p1802_p8 }
 0x1fe   : > { %v543_v0 = vadd.f32 %v541_v45, %v533_v19 }
 0x1ff   : > { %v551_v14 = vsel %vm486_vm13, %v549_v23, %v550_v59  ;;  %vm976_vm13 = vcmp.ge.s32.totalorder %v416_v47, 4294967295 }
 0x200   : > { %v553_v48 = vadd.f32 %v551_v14, %v543_v0  ;;  %vm2609_vm5 = vmand %vm976_vm13, %vm977_vm14 }
 0x202   : > { %v554_v56 = vsel %vm2591_vm8, %v553_v48, 0.0  ;;  %vm1257_vm8 = vcmp.lt.s32.totalorder %v416_v47, 13 }
 0x23c   : > { %v689_v3 = vpop.permute.xlu0 %688 }
 0x23d   : > { %v690_v52 = vrot.slane %v689_v3, 1 }
 0x23f   : > { %v692_v58 = vsel %vm691_vm0, %v689_v3, %v690_v52  ;;  %vm2601_vm0 = vmand %vm836_vm9, %vm837_vm10  ;;  %vm1391_vm9 = vcmask 998400  }
 0x240   : > { %v694_v27 = vsel %vm2587_vm7, %v692_v58, 0.0  ;;  %vm1256_vm7 = vcmp.ge.s32.totalorder %v416_v47, 4294967293 }
 0x241   : > { %v695_v31 = vadd.f32 %v694_v27, %v554_v56  ;;  %vm1258_vm10 = vmand %vm1256_vm7, %vm1257_vm8 }
 0x248   : > { %v829_v62 = vpop.permute.xlu1 %828 }
 0x249   : > { %v830_v24 = vrot.slane %v829_v62, 1 }
 0x24b   : > { %v832_v26 = vsel %vm831_vm6, %v829_v62, %v830_v24  ;;  %vm1118_vm6 = vmand %vm1116_vm1, %vm1117_vm2 }
 0x24c   : > { %v834_v44 = vsel %vm2595_vm12, %v832_v26, 0.0 }
 0x24d   : > { %v835_v16 = vadd.f32 %v834_v44, %v695_v31 }
 0x254   : > { %v969_v39 = vpop.permute.xlu0 %968 }
 0x255   : > { %v970_v36 = vrot.slane %v969_v39, 1 }
 0x257   : > { %v972_v28 = vsel %vm971_vm11, %v969_v39, %v970_v36 }
 0x258   : > { %v974_v29 = vsel %vm2601_vm0, %v972_v28, 0.0 }
 0x259   : > { %v975_v41 = vadd.f32 %v974_v29, %v835_v16 }
 0x260   : > { %v1109_v63 = vpop.permute.xlu1 %1108 }
 0x261   : > { %v1110_v20 = vrot.slane %v1109_v63, 1 }
 0x263   : > { %v1112_v33 = vsel %vm1111_vm15, %v1109_v63, %v1110_v20 }
 0x264   : > { %v1249_v57 = vpop.permute.xlu0 %1248  ;;  %v1114_v10 = vsel %vm2609_vm5, %v1112_v33, 0.0 }
 0x265   : > { %v1250_v46 = vrot.slane %v1249_v57, 1  ;;  %v1115_v42 = vadd.f32 %v1114_v10, %v975_v41 }
 0x267   : > { %v1252_v7 = vsel %vm1251_vm4, %v1249_v57, %v1250_v46 }
 0x268   : > { %v1254_v5 = vsel %vm1118_vm6, %v1252_v7, 0.0 }
 0x269   : > { %v1255_v8 = vadd.f32 %v1254_v5, %v1115_v42 }
 0x26a   : > { %v1389_v4 = vpop.permute.xlu1 %1388 }
 0x26b   : > { %v1390_v34 = vrot.slane %v1389_v4, 1 }
 0x26d   : > { %v1392_v55 = vsel %vm1391_vm9, %v1389_v4, %v1390_v34 }
 0x26e   : > { %v1394_v1 = vsel %vm1258_vm10, %v1392_v55, 0.0 }
 0x26f   : > { %v1395_v6 = vadd.f32 %v1394_v1, %v1255_v8 }
 0x271   : > { %v1398_v22 = vmul.f32 %v1397_v18, %v1395_v6 }
 0x273   : > { %v1401_v12 = vadd.f32 %v1400_v25, %v1398_v22 }
 0x275   : > { %1405 = vst.msk [vmem:[%s254_s10] sm:$0x3] %vm2069_vm3, %v1401_v12 }
 0x276   : > { %1812 = shalt.err (!%p1809_p12)
}
 0x277   : > { %s1813_s14 = scalar_lea.hbm %s1419_s23, 32  ;;  %s1817_s30 = scalar_lea.hbm %s2664_s4, 64 }
 0x278   : > { %p1814_p7 = scmp.ne.s32.totalorder %s1419_s23, %s1813_s14  ;;  %p1818_p9 = scmp.lt.s32.totalorder %s1419_s23, %s2664_s4 }
 0x279   : > { %p1819_p13 = scmp.lt.s32.totalorder %s1817_s30, %s1813_s14 }
 0x27a   : > { %p1815_p10 = pnand %p1814_p7, %p2029_p0 }
 0x27b   : > { %p1820_p3 = por %p1819_p13, %p1818_p9 }
 0x27c   : > { %p1816_p6 = pneg %p1815_p10 }
 0x27e   : > { %p1821_p1 = pnand %p1820_p3, %p1816_p6 }
 0x280   : > { %1824 = shalt.err (!%p1821_p1)
}
 0x281   : > { %1655 = dma.vmem_to_hbm [thread:$0]  (%p2029_p0), %s1422_s11, 32, %s1419_s23, %s1407_s27  }
 0x282 PF: > { %s1433_s9 = sand.u32 1, %s1867_s15   ;;  %p2700_p4 = scmp.ne.s32.totalorder %s2670_s26, 0 }
 0x283   : > { %p2701_p8 = scmp.ge.s32.totalorder %s1887_s20, 2  ;;  %s1434_s10 = scalar_lea.sflag [#allocation7], %s1433_s9 }
 0x285   : > { %p1669_p5 = pnand %p2701_p8, %p2700_p4 }
 0x287   : > { %p1670_p11 = pneg %p1669_p5 }
 0x289   : > { %1862 = dma.done.wait (%p1670_p11), %s1434_s10, 32  }
 0x28a   : > { %1864 = vsyncadd (%p1670_p11), %s1434_s10, 4294967264  ;;  %s22_s20 = sadd.s32 1, %s1887_s20   ;;  %s2702_s15 = smov %s1871_s16 }
 0x28b   : > { %p19_p2 = scmp.ge.s32.totalorder %s22_s20, 4   ;;  %s2703_s16 = smov %s1875_s17 }
 0x28c   : > { %s2704_s17 = smov %s2035_s22  ;;  %s2705_s18 = smov %s1883_s19 }
 0x28d   : > { %s2706_s19 = smov %s2708_s6  ;;  %21 = sbr.rel (!%p19_p2) target bundleno = 8 (0x8), region = 104 }
 0x292   :  { %1439 = vsyncpa [#allocation6], 1 }
 0x293   :  { %1441 = vsyncpa [#allocation6 + $0x1], 1 }
 0x294   :  { %1442 = vsyncpa [#allocation7], 1 }
 0x295   :  { %1444 = vsyncpa [#allocation7 + $0x1], 1 }
 0x296   :  { %1445 = vsyncpa [#allocation8], 1 }
 0x297   :  { %1447 = vsyncpa [#allocation8 + $0x1], 1 }
 0x298   :  { %1448 = vsyncpa [#allocation9], 1 }
 0x299   :  { %1450 = vsyncpa [#allocation9 + $0x1], 1 }

</bundles_post_ra>
